<compile_context>
chip_gen: v5e
topology: v5e:2x2
jax: 0.10.0
libtpu: 0.0.40
codegen_flags: <defaults>
</compile_context>

<pallas_src>
import functools
import math

import jax
import jax.numpy as jnp
from jax.experimental import pallas as pl
from jax.experimental.pallas import tpu as pltpu

D_MODEL = 32
N_HEADS = 4
FF_SIZE = 64
EPS = 1e-6
NEG_INF = -1e9


def _layer_norm(x, alpha, bias):
    # alpha * (x - mean) / (std + eps) + bias, std with ddof=1 (tutorial LayerNormalization).
    mean = jnp.mean(x, axis=-1, keepdims=True)
    d = x - mean
    var = jnp.sum(d * d, axis=-1, keepdims=True) * (1.0 / (x.shape[-1] - 1))
    std = jnp.sqrt(var)
    inv = pl.reciprocal(std + EPS, approx=True)      # EUP, keeps the VALU path free
    return alpha * d * inv + bias


def _softmax(x):
    m = jnp.max(x, axis=-1, keepdims=True)
    e = jnp.exp(x - m)
    return e * pl.reciprocal(jnp.sum(e, axis=-1, keepdims=True), approx=True)


def _attention_core(q, k, v, mask_add, wo, B, Sq, Skv, H):
    """q: (B*Sq, D) f32, k/v: (B*Skv, D) f32, mask_add: (B, Sq, Skv) f32 additive mask,
    wo: (D, D) bf16.  Returns (B*Sq, D) f32."""
    D = q.shape[-1]
    dk = D // H
    scale = 1.0 / math.sqrt(dk)
    # Batch folded over B via 3D (batched) einsums; heads stay an unrolled Python loop
    # (D=32 fits one lane group, so a 4D head-batched transpose would just trade one
    #  relayout for another at these shapes).
    q3 = q.reshape(B, Sq, D).astype(jnp.bfloat16)
    k3 = k.reshape(B, Skv, D).astype(jnp.bfloat16)
    v3 = v.reshape(B, Skv, D).astype(jnp.bfloat16)
    heads = []
    for h in range(H):
        lo = h * dk
        qi = q3[:, :, lo:lo + dk]
        ki = k3[:, :, lo:lo + dk]
        vi = v3[:, :, lo:lo + dk]
        s = jnp.einsum('bqd,bkd->bqk', qi, ki,
                       preferred_element_type=jnp.float32) * scale + mask_add
        p = _softmax(s)
        heads.append(jnp.einsum('bqk,bkd->bqd', p.astype(jnp.bfloat16), vi,
                                preferred_element_type=jnp.float32))
    # Concat heads once, then a single Wo matmul (instead of 4 sliced Wo matmuls + adds).
    ctx = jnp.concatenate(heads, axis=-1).reshape(B * Sq, D).astype(jnp.bfloat16)
    return jnp.dot(ctx, wo, preferred_element_type=jnp.float32)


def _self_attention(x2d, mask_add, wqkv, wo, B, S, H):
    D = x2d.shape[-1]
    qkv = jnp.dot(x2d.astype(jnp.bfloat16), wqkv,
                  preferred_element_type=jnp.float32)          # (B*S, 3D), one fused matmul
    q = qkv[:, :D]
    k = qkv[:, D:2 * D]
    v = qkv[:, 2 * D:]
    return _attention_core(q, k, v, mask_add, wo, B, S, S, H)


def _cross_attention(x2d, enc2d, mask_add, wq, wkv, wo, B, Sq, Skv, H):
    D = x2d.shape[-1]
    q = jnp.dot(x2d.astype(jnp.bfloat16), wq, preferred_element_type=jnp.float32)
    kv = jnp.dot(enc2d.astype(jnp.bfloat16), wkv,
                 preferred_element_type=jnp.float32)           # (B*Skv, 2D), fused K|V matmul
    k = kv[:, :D]
    v = kv[:, D:]
    return _attention_core(q, k, v, mask_add, wo, B, Sq, Skv, H)


def decoder_layer_kernel(
    x_ref, enc_ref, dec_mask_ref, enc_mask_ref,
    sa_wqkv_ref, sa_wo_ref,
    ca_wq_ref, ca_wkv_ref, ca_wo_ref,
    ff_w1_ref, ff_b1_ref, ff_w2_ref, ff_b2_ref,
    ln_ref,
    out_ref,
    *, B, S, Se, H,
):
    # TODO(synk): dropout omitted everywhere (eval-mode semantics; dropout == identity).
    x = x_ref[...]          # (B*S, D) f32
    enc = enc_ref[...]      # (B*Se, D) f32

    # Mask -> additive float mask, computed ONCE per attention block (hoisted out of the
    # head loop; inside the loop the mask is a plain fused add).
    dec_add = jnp.where(dec_mask_ref[...] == 0, NEG_INF, 0.0)   # (B, S, S)  f32
    enc_add = jnp.where(enc_mask_ref[...] == 0, NEG_INF, 0.0)   # (B, S, Se) f32

    ln = ln_ref[...]        # (6, D): [ln0_a, ln0_b, ln1_a, ln1_b, ln2_a, ln2_b]

    # Residual connection 0: self-attention on LayerNorm(x)
    h0 = _layer_norm(x, ln[0:1], ln[1:2])
    x = x + _self_attention(h0, dec_add, sa_wqkv_ref[...], sa_wo_ref[...], B, S, H)

    # Residual connection 1: cross-attention with encoder output
    h1 = _layer_norm(x, ln[2:3], ln[3:4])
    x = x + _cross_attention(h1, enc, enc_add,
                             ca_wq_ref[...], ca_wkv_ref[...], ca_wo_ref[...],
                             B, S, Se, H)

    # Residual connection 2: feed-forward block
    h2 = _layer_norm(x, ln[4:5], ln[5:6])
    hidden = jnp.maximum(
        jnp.dot(h2.astype(jnp.bfloat16), ff_w1_ref[...],
                preferred_element_type=jnp.float32) + ff_b1_ref[...],
        0.0)
    ff_out = jnp.dot(hidden.astype(jnp.bfloat16), ff_w2_ref[...],
                     preferred_element_type=jnp.float32) + ff_b2_ref[...]

    out_ref[...] = (x + ff_out).astype(out_ref.dtype)


def transformer_decoder_layer(x, encoder_out, enc_mask, dec_mask, params):
    """x: (B, S, D) f32, encoder_out: (B, Se, D) f32,
       enc_mask: (B, S, Se) int32, dec_mask: (B, S, S) int32."""
    B, S, D = x.shape
    _, Se, _ = encoder_out.shape
    H = N_HEADS

    # Fold batch into the matmul M dimension; masks stay 3D for batched score masking.
    x2d = x.reshape(B * S, D)
    enc2d = encoder_out.reshape(B * Se, D)

    bf16 = lambda w: w.astype(jnp.bfloat16)   # MXU operands in bf16, f32 accumulation
    inputs = [
        x2d, enc2d,
        dec_mask.astype(jnp.int32), enc_mask.astype(jnp.int32),
        bf16(params["sa_wqkv"]), bf16(params["sa_wo"]),
        bf16(params["ca_wq"]), bf16(params["ca_wkv"]), bf16(params["ca_wo"]),
        bf16(params["ff_w1"]), params["ff_b1"], bf16(params["ff_w2"]), params["ff_b2"],
        params["ln"],
    ]

    def full_spec(a):
        nd = a.ndim
        return pl.BlockSpec(a.shape, lambda i, _nd=nd: (0,) * _nd)

    kernel = functools.partial(decoder_layer_kernel, B=B, S=S, Se=Se, H=H)

    # Single grid step: the whole (tiny) problem fits VMEM; per-grid-step overhead was the
    # dominant cost of the previous grid=(B,) launch. For large B on v7x, re-introduce a
    # "parallel" batch-tile axis so both TensorCores get work.
    out2d = pl.pallas_call(
        kernel,
        out_shape=jax.ShapeDtypeStruct((B * S, D), jnp.float32),
        grid=(1,),
        in_specs=[full_spec(a) for a in inputs],
        out_specs=pl.BlockSpec((B * S, D), lambda i: (0, 0)),
        compiler_params=pltpu.CompilerParams(dimension_semantics=("arbitrary",)),
    )(*inputs)

    return out2d.reshape(B, S, D)


def init_params(key, d_model, ff_size):
    ks = jax.random.split(key, 9)
    scale = 0.02

    def w(k, shape):
        return (scale * jax.random.normal(k, shape)).astype(jnp.float32)

    # LN params packed: rows [ln0_a, ln0_b, ln1_a, ln1_b, ln2_a, ln2_b]
    ln = jnp.concatenate(
        [jnp.ones((1, d_model), jnp.float32), jnp.zeros((1, d_model), jnp.float32)] * 3,
        axis=0)

    return {
        # self-attention: fused Wq|Wk|Wv (bias=False), plus Wo; stored (in, out)
        "sa_wqkv": w(ks[0], (d_model, 3 * d_model)),
        "sa_wo": w(ks[1], (d_model, d_model)),
        # cross-attention: Wq separate (decoder side), fused Wk|Wv (encoder side), Wo
        "ca_wq": w(ks[2], (d_model, d_model)),
        "ca_wkv": w(ks[3], (d_model, 2 * d_model)),
        "ca_wo": w(ks[4], (d_model, d_model)),
        # feed-forward
        "ff_w1": w(ks[5], (d_model, ff_size)),
        "ff_b1": w(ks[6], (1, ff_size)),
        "ff_w2": w(ks[7], (ff_size, d_model)),
        "ff_b2": w(ks[8], (1, d_model)),
        # packed LayerNorm params
        "ln": ln,
    }


if __name__ == "__main__":
    B, S, Se = 2, 8, 8
    key = jax.random.PRNGKey(0)
    k_x, k_enc, k_p = jax.random.split(key, 3)

    x = jax.random.normal(k_x, (B, S, D_MODEL), dtype=jnp.float32)
    encoder_out = jax.random.normal(k_enc, (B, Se, D_MODEL), dtype=jnp.float32)

    # decoder mask: causal (lower-triangular) per batch element
    dec_mask = jnp.broadcast_to(
        jnp.tril(jnp.ones((S, S), jnp.int32)), (B, S, S)).astype(jnp.int32)
    # encoder mask: all valid, except batch 1 has the last 2 encoder positions padded
    enc_mask = jnp.ones((B, S, Se), jnp.int32)
    enc_mask = enc_mask.at[1, :, Se - 2:].set(0)

    params = init_params(k_p, D_MODEL, FF_SIZE)

    out = transformer_decoder_layer(x, encoder_out, enc_mask, dec_mask, params)
    out = jax.block_until_ready(out)
    assert out.shape == (B, S, D_MODEL) and bool(jnp.all(jnp.isfinite(out)))
    print("KERNEL_OK")
</pallas_src>

<mosaic_0001>
module attributes {stable_mosaic.version = 11 : i64} {
  func.func @decoder_layer_kernel(%arg0: i32, %arg1: memref<16x32xf32, #tpu.memory_space<vmem>>, %arg2: memref<16x32xf32, #tpu.memory_space<vmem>>, %arg3: memref<2x8x8xi32, #tpu.memory_space<vmem>>, %arg4: memref<2x8x8xi32, #tpu.memory_space<vmem>>, %arg5: memref<32x96xbf16, #tpu.memory_space<vmem>>, %arg6: memref<32x32xbf16, #tpu.memory_space<vmem>>, %arg7: memref<32x32xbf16, #tpu.memory_space<vmem>>, %arg8: memref<32x64xbf16, #tpu.memory_space<vmem>>, %arg9: memref<32x32xbf16, #tpu.memory_space<vmem>>, %arg10: memref<32x64xbf16, #tpu.memory_space<vmem>>, %arg11: memref<1x64xf32, #tpu.memory_space<vmem>>, %arg12: memref<64x32xbf16, #tpu.memory_space<vmem>>, %arg13: memref<1x32xf32, #tpu.memory_space<vmem>>, %arg14: memref<6x32xf32, #tpu.memory_space<vmem>>, %arg15: memref<16x32xf32, #tpu.memory_space<vmem>>) attributes {dimension_semantics = [#tpu.dimension_semantics<arbitrary>], iteration_bounds = array<i64: 1>, scalar_prefetch = 0 : i64, scratch_operands = 0 : i64, tpu.core_type = #tpu.core_type<tc>, window_params = [{pipeline_mode = #tpu.pipeline_mode<synchronous>, transform_indices = @transform_0, window_bounds = array<i64: 16, 32>}, {pipeline_mode = #tpu.pipeline_mode<synchronous>, transform_indices = @transform_1, window_bounds = array<i64: 16, 32>}, {pipeline_mode = #tpu.pipeline_mode<synchronous>, transform_indices = @transform_2, window_bounds = array<i64: 2, 8, 8>}, {pipeline_mode = #tpu.pipeline_mode<synchronous>, transform_indices = @transform_3, window_bounds = array<i64: 2, 8, 8>}, {pipeline_mode = #tpu.pipeline_mode<synchronous>, transform_indices = @transform_4, window_bounds = array<i64: 32, 96>}, {pipeline_mode = #tpu.pipeline_mode<synchronous>, transform_indices = @transform_5, window_bounds = array<i64: 32, 32>}, {pipeline_mode = #tpu.pipeline_mode<synchronous>, transform_indices = @transform_6, window_bounds = array<i64: 32, 32>}, {pipeline_mode = #tpu.pipeline_mode<synchronous>, transform_indices = @transform_7, window_bounds = array<i64: 32, 64>}, {pipeline_mode = #tpu.pipeline_mode<synchronous>, transform_indices = @transform_8, window_bounds = array<i64: 32, 32>}, {pipeline_mode = #tpu.pipeline_mode<synchronous>, transform_indices = @transform_9, window_bounds = array<i64: 32, 64>}, {pipeline_mode = #tpu.pipeline_mode<synchronous>, transform_indices = @transform_10, window_bounds = array<i64: 1, 64>}, {pipeline_mode = #tpu.pipeline_mode<synchronous>, transform_indices = @transform_11, window_bounds = array<i64: 64, 32>}, {pipeline_mode = #tpu.pipeline_mode<synchronous>, transform_indices = @transform_12, window_bounds = array<i64: 1, 32>}, {pipeline_mode = #tpu.pipeline_mode<synchronous>, transform_indices = @transform_13, window_bounds = array<i64: 6, 32>}, {pipeline_mode = #tpu.pipeline_mode<synchronous>, transform_indices = @transform_14, window_bounds = array<i64: 16, 32>}]} {
    %c0 = arith.constant 0 : index
    %c0_0 = arith.constant 0 : index
    %0 = vector.load %arg1[%c0, %c0_0] : memref<16x32xf32, #tpu.memory_space<vmem>>, vector<16x32xf32>
    %c0_1 = arith.constant 0 : index
    %c0_2 = arith.constant 0 : index
    %1 = vector.load %arg2[%c0_1, %c0_2] : memref<16x32xf32, #tpu.memory_space<vmem>>, vector<16x32xf32>
    %c0_3 = arith.constant 0 : index
    %c0_4 = arith.constant 0 : index
    %c0_5 = arith.constant 0 : index
    %2 = vector.load %arg3[%c0_3, %c0_4, %c0_5] : memref<2x8x8xi32, #tpu.memory_space<vmem>>, vector<2x8x8xi32>
    %c0_i32 = arith.constant 0 : i32
    %3 = vector.broadcast %c0_i32 : i32 to vector<2x8x8xi32>
    %4 = arith.cmpi eq, %2, %3 : vector<2x8x8xi32>
    %cst = arith.constant -1.000000e+09 : f32
    %cst_6 = arith.constant 0.000000e+00 : f32
    %5 = vector.broadcast %cst : f32 to vector<2x8x8xf32>
    %6 = vector.broadcast %cst_6 : f32 to vector<2x8x8xf32>
    %7 = arith.select %4, %5, %6 : vector<2x8x8xi1>, vector<2x8x8xf32>
    %c0_7 = arith.constant 0 : index
    %c0_8 = arith.constant 0 : index
    %c0_9 = arith.constant 0 : index
    %8 = vector.load %arg4[%c0_7, %c0_8, %c0_9] : memref<2x8x8xi32, #tpu.memory_space<vmem>>, vector<2x8x8xi32>
    %c0_i32_10 = arith.constant 0 : i32
    %9 = vector.broadcast %c0_i32_10 : i32 to vector<2x8x8xi32>
    %10 = arith.cmpi eq, %8, %9 : vector<2x8x8xi32>
    %cst_11 = arith.constant -1.000000e+09 : f32
    %cst_12 = arith.constant 0.000000e+00 : f32
    %11 = vector.broadcast %cst_11 : f32 to vector<2x8x8xf32>
    %12 = vector.broadcast %cst_12 : f32 to vector<2x8x8xf32>
    %13 = arith.select %10, %11, %12 : vector<2x8x8xi1>, vector<2x8x8xf32>
    %c0_13 = arith.constant 0 : index
    %c0_14 = arith.constant 0 : index
    %14 = vector.load %arg14[%c0_13, %c0_14] : memref<6x32xf32, #tpu.memory_space<vmem>>, vector<6x32xf32>
    %15 = vector.extract_strided_slice %14 {offsets = [0, 0], sizes = [1, 32], strides = [1, 1]} : vector<6x32xf32> to vector<1x32xf32>
    %16 = vector.extract_strided_slice %14 {offsets = [1, 0], sizes = [1, 32], strides = [1, 1]} : vector<6x32xf32> to vector<1x32xf32>
    %cst_15 = arith.constant dense<0.000000e+00> : vector<16xf32>
    %17 = vector.multi_reduction <add>, %0, %cst_15 [1] : vector<16x32xf32> to vector<16xf32>
    %18 = vector.shape_cast %17 : vector<16xf32> to vector<16x1xf32>
    %cst_16 = arith.constant 3.200000e+01 : f32
    %19 = vector.broadcast %cst_16 : f32 to vector<16x1xf32>
    %20 = arith.divf %18, %19 : vector<16x1xf32>
    %21 = vector.broadcast %20 : vector<16x1xf32> to vector<16x32xf32>
    %22 = arith.subf %0, %21 : vector<16x32xf32>
    %23 = arith.mulf %22, %22 : vector<16x32xf32>
    %cst_17 = arith.constant dense<0.000000e+00> : vector<16xf32>
    %24 = vector.multi_reduction <add>, %23, %cst_17 [1] : vector<16x32xf32> to vector<16xf32>
    %25 = vector.shape_cast %24 : vector<16xf32> to vector<16x1xf32>
    %cst_18 = arith.constant 0.0322580636 : f32
    %26 = vector.broadcast %cst_18 : f32 to vector<16x1xf32>
    %27 = arith.mulf %25, %26 : vector<16x1xf32>
    %28 = math.sqrt %27 : vector<16x1xf32>
    %cst_19 = arith.constant 9.99999997E-7 : f32
    %29 = vector.broadcast %cst_19 : f32 to vector<16x1xf32>
    %30 = arith.addf %28, %29 : vector<16x1xf32>
    %31 = tpu.reciprocal %30 {approx = true} : vector<16x1xf32> -> vector<16x1xf32>
    %32 = vector.broadcast %15 : vector<1x32xf32> to vector<16x32xf32>
    %33 = arith.mulf %32, %22 : vector<16x32xf32>
    %34 = vector.broadcast %31 : vector<16x1xf32> to vector<16x32xf32>
    %35 = arith.mulf %33, %34 : vector<16x32xf32>
    %36 = vector.broadcast %16 : vector<1x32xf32> to vector<16x32xf32>
    %37 = arith.addf %35, %36 : vector<16x32xf32>
    %c0_20 = arith.constant 0 : index
    %c0_21 = arith.constant 0 : index
    %38 = vector.load %arg5[%c0_20, %c0_21] : memref<32x96xbf16, #tpu.memory_space<vmem>>, vector<32x96xbf16>
    %c0_22 = arith.constant 0 : index
    %c0_23 = arith.constant 0 : index
    %39 = vector.load %arg6[%c0_22, %c0_23] : memref<32x32xbf16, #tpu.memory_space<vmem>>, vector<32x32xbf16>
    %40 = arith.truncf %37 : vector<16x32xf32> to vector<16x32xbf16>
    %cst_24 = arith.constant dense<0.000000e+00> : vector<16x96xf32>
    %41 = tpu.matmul %40, %38, %cst_24 {dimension_numbers = #tpu.dot_dimension_numbers<[1], [0], [0], [1], [0, 0, 1, 1], [], []>} : vector<16x32xbf16>, vector<32x96xbf16>, vector<16x96xf32> -> vector<16x96xf32>
    %42 = vector.extract_strided_slice %41 {offsets = [0, 0], sizes = [16, 32], strides = [1, 1]} : vector<16x96xf32> to vector<16x32xf32>
    %43 = vector.extract_strided_slice %41 {offsets = [0, 32], sizes = [16, 32], strides = [1, 1]} : vector<16x96xf32> to vector<16x32xf32>
    %44 = vector.extract_strided_slice %41 {offsets = [0, 64], sizes = [16, 32], strides = [1, 1]} : vector<16x96xf32> to vector<16x32xf32>
    %45 = vector.shape_cast %42 : vector<16x32xf32> to vector<2x8x32xf32>
    %46 = arith.truncf %45 : vector<2x8x32xf32> to vector<2x8x32xbf16>
    %47 = vector.shape_cast %43 : vector<16x32xf32> to vector<2x8x32xf32>
    %48 = arith.truncf %47 : vector<2x8x32xf32> to vector<2x8x32xbf16>
    %49 = vector.shape_cast %44 : vector<16x32xf32> to vector<2x8x32xf32>
    %50 = arith.truncf %49 : vector<2x8x32xf32> to vector<2x8x32xbf16>
    %51 = vector.extract_strided_slice %46 {offsets = [0, 0, 0], sizes = [2, 8, 8], strides = [1, 1, 1]} : vector<2x8x32xbf16> to vector<2x8x8xbf16>
    %52 = vector.extract_strided_slice %48 {offsets = [0, 0, 0], sizes = [2, 8, 8], strides = [1, 1, 1]} : vector<2x8x32xbf16> to vector<2x8x8xbf16>
    %53 = vector.extract_strided_slice %50 {offsets = [0, 0, 0], sizes = [2, 8, 8], strides = [1, 1, 1]} : vector<2x8x32xbf16> to vector<2x8x8xbf16>
    "tpu.trace_start"() <{level = 10 : i32, message = "bqd,bkd->bqk"}> : () -> ()
    %cst_25 = arith.constant dense<0.000000e+00> : vector<2x8x8xf32>
    %54 = tpu.matmul %51, %52, %cst_25 {dimension_numbers = #tpu.dot_dimension_numbers<[2], [2], [1], [1], [0, 0, 0, 1, 1, 1], [0], [0]>} : vector<2x8x8xbf16>, vector<2x8x8xbf16>, vector<2x8x8xf32> -> vector<2x8x8xf32>
    "tpu.trace_stop"() : () -> ()
    %cst_26 = arith.constant 0.353553385 : f32
    %55 = vector.broadcast %cst_26 : f32 to vector<2x8x8xf32>
    %56 = arith.mulf %54, %55 : vector<2x8x8xf32>
    %57 = arith.addf %56, %7 : vector<2x8x8xf32>
    %cst_27 = arith.constant dense<0xFF800000> : vector<2x8xf32>
    %58 = vector.multi_reduction <maximumf>, %57, %cst_27 [2] : vector<2x8x8xf32> to vector<2x8xf32>
    %59 = vector.shape_cast %58 : vector<2x8xf32> to vector<2x8x1xf32>
    %60 = vector.broadcast %59 : vector<2x8x1xf32> to vector<2x8x8xf32>
    %61 = arith.subf %57, %60 : vector<2x8x8xf32>
    %62 = math.exp %61 : vector<2x8x8xf32>
    %cst_28 = arith.constant dense<0.000000e+00> : vector<2x8xf32>
    %63 = vector.multi_reduction <add>, %62, %cst_28 [2] : vector<2x8x8xf32> to vector<2x8xf32>
    %64 = vector.shape_cast %63 : vector<2x8xf32> to vector<2x8x1xf32>
    %65 = tpu.reciprocal %64 {approx = true} : vector<2x8x1xf32> -> vector<2x8x1xf32>
    %66 = vector.broadcast %65 : vector<2x8x1xf32> to vector<2x8x8xf32>
    %67 = arith.mulf %62, %66 : vector<2x8x8xf32>
    %68 = arith.truncf %67 : vector<2x8x8xf32> to vector<2x8x8xbf16>
    "tpu.trace_start"() <{level = 10 : i32, message = "bqk,bkd->bqd"}> : () -> ()
    %cst_29 = arith.constant dense<0.000000e+00> : vector<2x8x8xf32>
    %69 = tpu.matmul %68, %53, %cst_29 {dimension_numbers = #tpu.dot_dimension_numbers<[2], [1], [1], [2], [0, 0, 0, 1, 1, 2], [0], [0]>} : vector<2x8x8xbf16>, vector<2x8x8xbf16>, vector<2x8x8xf32> -> vector<2x8x8xf32>
    "tpu.trace_stop"() : () -> ()
    %70 = vector.extract_strided_slice %46 {offsets = [0, 0, 8], sizes = [2, 8, 8], strides = [1, 1, 1]} : vector<2x8x32xbf16> to vector<2x8x8xbf16>
    %71 = vector.extract_strided_slice %48 {offsets = [0, 0, 8], sizes = [2, 8, 8], strides = [1, 1, 1]} : vector<2x8x32xbf16> to vector<2x8x8xbf16>
    %72 = vector.extract_strided_slice %50 {offsets = [0, 0, 8], sizes = [2, 8, 8], strides = [1, 1, 1]} : vector<2x8x32xbf16> to vector<2x8x8xbf16>
    "tpu.trace_start"() <{level = 10 : i32, message = "bqd,bkd->bqk"}> : () -> ()
    %cst_30 = arith.constant dense<0.000000e+00> : vector<2x8x8xf32>
    %73 = tpu.matmul %70, %71, %cst_30 {dimension_numbers = #tpu.dot_dimension_numbers<[2], [2], [1], [1], [0, 0, 0, 1, 1, 1], [0], [0]>} : vector<2x8x8xbf16>, vector<2x8x8xbf16>, vector<2x8x8xf32> -> vector<2x8x8xf32>
    "tpu.trace_stop"() : () -> ()
    %cst_31 = arith.constant 0.353553385 : f32
    %74 = vector.broadcast %cst_31 : f32 to vector<2x8x8xf32>
    %75 = arith.mulf %73, %74 : vector<2x8x8xf32>
    %76 = arith.addf %75, %7 : vector<2x8x8xf32>
    %cst_32 = arith.constant dense<0xFF800000> : vector<2x8xf32>
    %77 = vector.multi_reduction <maximumf>, %76, %cst_32 [2] : vector<2x8x8xf32> to vector<2x8xf32>
    %78 = vector.shape_cast %77 : vector<2x8xf32> to vector<2x8x1xf32>
    %79 = vector.broadcast %78 : vector<2x8x1xf32> to vector<2x8x8xf32>
    %80 = arith.subf %76, %79 : vector<2x8x8xf32>
    %81 = math.exp %80 : vector<2x8x8xf32>
    %cst_33 = arith.constant dense<0.000000e+00> : vector<2x8xf32>
    %82 = vector.multi_reduction <add>, %81, %cst_33 [2] : vector<2x8x8xf32> to vector<2x8xf32>
    %83 = vector.shape_cast %82 : vector<2x8xf32> to vector<2x8x1xf32>
    %84 = tpu.reciprocal %83 {approx = true} : vector<2x8x1xf32> -> vector<2x8x1xf32>
    %85 = vector.broadcast %84 : vector<2x8x1xf32> to vector<2x8x8xf32>
    %86 = arith.mulf %81, %85 : vector<2x8x8xf32>
    %87 = arith.truncf %86 : vector<2x8x8xf32> to vector<2x8x8xbf16>
    "tpu.trace_start"() <{level = 10 : i32, message = "bqk,bkd->bqd"}> : () -> ()
    %cst_34 = arith.constant dense<0.000000e+00> : vector<2x8x8xf32>
    %88 = tpu.matmul %87, %72, %cst_34 {dimension_numbers = #tpu.dot_dimension_numbers<[2], [1], [1], [2], [0, 0, 0, 1, 1, 2], [0], [0]>} : vector<2x8x8xbf16>, vector<2x8x8xbf16>, vector<2x8x8xf32> -> vector<2x8x8xf32>
    "tpu.trace_stop"() : () -> ()
    %89 = vector.extract_strided_slice %46 {offsets = [0, 0, 16], sizes = [2, 8, 8], strides = [1, 1, 1]} : vector<2x8x32xbf16> to vector<2x8x8xbf16>
    %90 = vector.extract_strided_slice %48 {offsets = [0, 0, 16], sizes = [2, 8, 8], strides = [1, 1, 1]} : vector<2x8x32xbf16> to vector<2x8x8xbf16>
    %91 = vector.extract_strided_slice %50 {offsets = [0, 0, 16], sizes = [2, 8, 8], strides = [1, 1, 1]} : vector<2x8x32xbf16> to vector<2x8x8xbf16>
    "tpu.trace_start"() <{level = 10 : i32, message = "bqd,bkd->bqk"}> : () -> ()
    %cst_35 = arith.constant dense<0.000000e+00> : vector<2x8x8xf32>
    %92 = tpu.matmul %89, %90, %cst_35 {dimension_numbers = #tpu.dot_dimension_numbers<[2], [2], [1], [1], [0, 0, 0, 1, 1, 1], [0], [0]>} : vector<2x8x8xbf16>, vector<2x8x8xbf16>, vector<2x8x8xf32> -> vector<2x8x8xf32>
    "tpu.trace_stop"() : () -> ()
    %cst_36 = arith.constant 0.353553385 : f32
    %93 = vector.broadcast %cst_36 : f32 to vector<2x8x8xf32>
    %94 = arith.mulf %92, %93 : vector<2x8x8xf32>
    %95 = arith.addf %94, %7 : vector<2x8x8xf32>
    %cst_37 = arith.constant dense<0xFF800000> : vector<2x8xf32>
    %96 = vector.multi_reduction <maximumf>, %95, %cst_37 [2] : vector<2x8x8xf32> to vector<2x8xf32>
    %97 = vector.shape_cast %96 : vector<2x8xf32> to vector<2x8x1xf32>
    %98 = vector.broadcast %97 : vector<2x8x1xf32> to vector<2x8x8xf32>
    %99 = arith.subf %95, %98 : vector<2x8x8xf32>
    %100 = math.exp %99 : vector<2x8x8xf32>
    %cst_38 = arith.constant dense<0.000000e+00> : vector<2x8xf32>
    %101 = vector.multi_reduction <add>, %100, %cst_38 [2] : vector<2x8x8xf32> to vector<2x8xf32>
    %102 = vector.shape_cast %101 : vector<2x8xf32> to vector<2x8x1xf32>
    %103 = tpu.reciprocal %102 {approx = true} : vector<2x8x1xf32> -> vector<2x8x1xf32>
    %104 = vector.broadcast %103 : vector<2x8x1xf32> to vector<2x8x8xf32>
    %105 = arith.mulf %100, %104 : vector<2x8x8xf32>
    %106 = arith.truncf %105 : vector<2x8x8xf32> to vector<2x8x8xbf16>
    "tpu.trace_start"() <{level = 10 : i32, message = "bqk,bkd->bqd"}> : () -> ()
    %cst_39 = arith.constant dense<0.000000e+00> : vector<2x8x8xf32>
    %107 = tpu.matmul %106, %91, %cst_39 {dimension_numbers = #tpu.dot_dimension_numbers<[2], [1], [1], [2], [0, 0, 0, 1, 1, 2], [0], [0]>} : vector<2x8x8xbf16>, vector<2x8x8xbf16>, vector<2x8x8xf32> -> vector<2x8x8xf32>
    "tpu.trace_stop"() : () -> ()
    %108 = vector.extract_strided_slice %46 {offsets = [0, 0, 24], sizes = [2, 8, 8], strides = [1, 1, 1]} : vector<2x8x32xbf16> to vector<2x8x8xbf16>
    %109 = vector.extract_strided_slice %48 {offsets = [0, 0, 24], sizes = [2, 8, 8], strides = [1, 1, 1]} : vector<2x8x32xbf16> to vector<2x8x8xbf16>
    %110 = vector.extract_strided_slice %50 {offsets = [0, 0, 24], sizes = [2, 8, 8], strides = [1, 1, 1]} : vector<2x8x32xbf16> to vector<2x8x8xbf16>
    "tpu.trace_start"() <{level = 10 : i32, message = "bqd,bkd->bqk"}> : () -> ()
    %cst_40 = arith.constant dense<0.000000e+00> : vector<2x8x8xf32>
    %111 = tpu.matmul %108, %109, %cst_40 {dimension_numbers = #tpu.dot_dimension_numbers<[2], [2], [1], [1], [0, 0, 0, 1, 1, 1], [0], [0]>} : vector<2x8x8xbf16>, vector<2x8x8xbf16>, vector<2x8x8xf32> -> vector<2x8x8xf32>
    "tpu.trace_stop"() : () -> ()
    %cst_41 = arith.constant 0.353553385 : f32
    %112 = vector.broadcast %cst_41 : f32 to vector<2x8x8xf32>
    %113 = arith.mulf %111, %112 : vector<2x8x8xf32>
    %114 = arith.addf %113, %7 : vector<2x8x8xf32>
    %cst_42 = arith.constant dense<0xFF800000> : vector<2x8xf32>
    %115 = vector.multi_reduction <maximumf>, %114, %cst_42 [2] : vector<2x8x8xf32> to vector<2x8xf32>
    %116 = vector.shape_cast %115 : vector<2x8xf32> to vector<2x8x1xf32>
    %117 = vector.broadcast %116 : vector<2x8x1xf32> to vector<2x8x8xf32>
    %118 = arith.subf %114, %117 : vector<2x8x8xf32>
    %119 = math.exp %118 : vector<2x8x8xf32>
    %cst_43 = arith.constant dense<0.000000e+00> : vector<2x8xf32>
    %120 = vector.multi_reduction <add>, %119, %cst_43 [2] : vector<2x8x8xf32> to vector<2x8xf32>
    %121 = vector.shape_cast %120 : vector<2x8xf32> to vector<2x8x1xf32>
    %122 = tpu.reciprocal %121 {approx = true} : vector<2x8x1xf32> -> vector<2x8x1xf32>
    %123 = vector.broadcast %122 : vector<2x8x1xf32> to vector<2x8x8xf32>
    %124 = arith.mulf %119, %123 : vector<2x8x8xf32>
    %125 = arith.truncf %124 : vector<2x8x8xf32> to vector<2x8x8xbf16>
    "tpu.trace_start"() <{level = 10 : i32, message = "bqk,bkd->bqd"}> : () -> ()
    %cst_44 = arith.constant dense<0.000000e+00> : vector<2x8x8xf32>
    %126 = tpu.matmul %125, %110, %cst_44 {dimension_numbers = #tpu.dot_dimension_numbers<[2], [1], [1], [2], [0, 0, 0, 1, 1, 2], [0], [0]>} : vector<2x8x8xbf16>, vector<2x8x8xbf16>, vector<2x8x8xf32> -> vector<2x8x8xf32>
    "tpu.trace_stop"() : () -> ()
    %127 = tpu.concatenate %69, %88, %107, %126 in 2 : vector<2x8x8xf32>, vector<2x8x8xf32>, vector<2x8x8xf32>, vector<2x8x8xf32> -> vector<2x8x32xf32>
    %128 = vector.shape_cast %127 : vector<2x8x32xf32> to vector<16x32xf32>
    %129 = arith.truncf %128 : vector<16x32xf32> to vector<16x32xbf16>
    %cst_45 = arith.constant dense<0.000000e+00> : vector<16x32xf32>
    %130 = tpu.matmul %129, %39, %cst_45 {dimension_numbers = #tpu.dot_dimension_numbers<[1], [0], [0], [1], [0, 0, 1, 1], [], []>} : vector<16x32xbf16>, vector<32x32xbf16>, vector<16x32xf32> -> vector<16x32xf32>
    %131 = arith.addf %0, %130 : vector<16x32xf32>
    %132 = vector.extract_strided_slice %14 {offsets = [2, 0], sizes = [1, 32], strides = [1, 1]} : vector<6x32xf32> to vector<1x32xf32>
    %133 = vector.extract_strided_slice %14 {offsets = [3, 0], sizes = [1, 32], strides = [1, 1]} : vector<6x32xf32> to vector<1x32xf32>
    %cst_46 = arith.constant dense<0.000000e+00> : vector<16xf32>
    %134 = vector.multi_reduction <add>, %131, %cst_46 [1] : vector<16x32xf32> to vector<16xf32>
    %135 = vector.shape_cast %134 : vector<16xf32> to vector<16x1xf32>
    %cst_47 = arith.constant 3.200000e+01 : f32
    %136 = vector.broadcast %cst_47 : f32 to vector<16x1xf32>
    %137 = arith.divf %135, %136 : vector<16x1xf32>
    %138 = vector.broadcast %137 : vector<16x1xf32> to vector<16x32xf32>
    %139 = arith.subf %131, %138 : vector<16x32xf32>
    %140 = arith.mulf %139, %139 : vector<16x32xf32>
    %cst_48 = arith.constant dense<0.000000e+00> : vector<16xf32>
    %141 = vector.multi_reduction <add>, %140, %cst_48 [1] : vector<16x32xf32> to vector<16xf32>
    %142 = vector.shape_cast %141 : vector<16xf32> to vector<16x1xf32>
    %cst_49 = arith.constant 0.0322580636 : f32
    %143 = vector.broadcast %cst_49 : f32 to vector<16x1xf32>
    %144 = arith.mulf %142, %143 : vector<16x1xf32>
    %145 = math.sqrt %144 : vector<16x1xf32>
    %cst_50 = arith.constant 9.99999997E-7 : f32
    %146 = vector.broadcast %cst_50 : f32 to vector<16x1xf32>
    %147 = arith.addf %145, %146 : vector<16x1xf32>
    %148 = tpu.reciprocal %147 {approx = true} : vector<16x1xf32> -> vector<16x1xf32>
    %149 = vector.broadcast %132 : vector<1x32xf32> to vector<16x32xf32>
    %150 = arith.mulf %149, %139 : vector<16x32xf32>
    %151 = vector.broadcast %148 : vector<16x1xf32> to vector<16x32xf32>
    %152 = arith.mulf %150, %151 : vector<16x32xf32>
    %153 = vector.broadcast %133 : vector<1x32xf32> to vector<16x32xf32>
    %154 = arith.addf %152, %153 : vector<16x32xf32>
    %c0_51 = arith.constant 0 : index
    %c0_52 = arith.constant 0 : index
    %155 = vector.load %arg7[%c0_51, %c0_52] : memref<32x32xbf16, #tpu.memory_space<vmem>>, vector<32x32xbf16>
    %c0_53 = arith.constant 0 : index
    %c0_54 = arith.constant 0 : index
    %156 = vector.load %arg8[%c0_53, %c0_54] : memref<32x64xbf16, #tpu.memory_space<vmem>>, vector<32x64xbf16>
    %c0_55 = arith.constant 0 : index
    %c0_56 = arith.constant 0 : index
    %157 = vector.load %arg9[%c0_55, %c0_56] : memref<32x32xbf16, #tpu.memory_space<vmem>>, vector<32x32xbf16>
    %158 = arith.truncf %154 : vector<16x32xf32> to vector<16x32xbf16>
    %cst_57 = arith.constant dense<0.000000e+00> : vector<16x32xf32>
    %159 = tpu.matmul %158, %155, %cst_57 {dimension_numbers = #tpu.dot_dimension_numbers<[1], [0], [0], [1], [0, 0, 1, 1], [], []>} : vector<16x32xbf16>, vector<32x32xbf16>, vector<16x32xf32> -> vector<16x32xf32>
    %160 = arith.truncf %1 : vector<16x32xf32> to vector<16x32xbf16>
    %cst_58 = arith.constant dense<0.000000e+00> : vector<16x64xf32>
    %161 = tpu.matmul %160, %156, %cst_58 {dimension_numbers = #tpu.dot_dimension_numbers<[1], [0], [0], [1], [0, 0, 1, 1], [], []>} : vector<16x32xbf16>, vector<32x64xbf16>, vector<16x64xf32> -> vector<16x64xf32>
    %162 = vector.extract_strided_slice %161 {offsets = [0, 0], sizes = [16, 32], strides = [1, 1]} : vector<16x64xf32> to vector<16x32xf32>
    %163 = vector.extract_strided_slice %161 {offsets = [0, 32], sizes = [16, 32], strides = [1, 1]} : vector<16x64xf32> to vector<16x32xf32>
    %164 = vector.shape_cast %159 : vector<16x32xf32> to vector<2x8x32xf32>
    %165 = arith.truncf %164 : vector<2x8x32xf32> to vector<2x8x32xbf16>
    %166 = vector.shape_cast %162 : vector<16x32xf32> to vector<2x8x32xf32>
    %167 = arith.truncf %166 : vector<2x8x32xf32> to vector<2x8x32xbf16>
    %168 = vector.shape_cast %163 : vector<16x32xf32> to vector<2x8x32xf32>
    %169 = arith.truncf %168 : vector<2x8x32xf32> to vector<2x8x32xbf16>
    %170 = vector.extract_strided_slice %165 {offsets = [0, 0, 0], sizes = [2, 8, 8], strides = [1, 1, 1]} : vector<2x8x32xbf16> to vector<2x8x8xbf16>
    %171 = vector.extract_strided_slice %167 {offsets = [0, 0, 0], sizes = [2, 8, 8], strides = [1, 1, 1]} : vector<2x8x32xbf16> to vector<2x8x8xbf16>
    %172 = vector.extract_strided_slice %169 {offsets = [0, 0, 0], sizes = [2, 8, 8], strides = [1, 1, 1]} : vector<2x8x32xbf16> to vector<2x8x8xbf16>
    "tpu.trace_start"() <{level = 10 : i32, message = "bqd,bkd->bqk"}> : () -> ()
    %cst_59 = arith.constant dense<0.000000e+00> : vector<2x8x8xf32>
    %173 = tpu.matmul %170, %171, %cst_59 {dimension_numbers = #tpu.dot_dimension_numbers<[2], [2], [1], [1], [0, 0, 0, 1, 1, 1], [0], [0]>} : vector<2x8x8xbf16>, vector<2x8x8xbf16>, vector<2x8x8xf32> -> vector<2x8x8xf32>
    "tpu.trace_stop"() : () -> ()
    %cst_60 = arith.constant 0.353553385 : f32
    %174 = vector.broadcast %cst_60 : f32 to vector<2x8x8xf32>
    %175 = arith.mulf %173, %174 : vector<2x8x8xf32>
    %176 = arith.addf %175, %13 : vector<2x8x8xf32>
    %cst_61 = arith.constant dense<0xFF800000> : vector<2x8xf32>
    %177 = vector.multi_reduction <maximumf>, %176, %cst_61 [2] : vector<2x8x8xf32> to vector<2x8xf32>
    %178 = vector.shape_cast %177 : vector<2x8xf32> to vector<2x8x1xf32>
    %179 = vector.broadcast %178 : vector<2x8x1xf32> to vector<2x8x8xf32>
    %180 = arith.subf %176, %179 : vector<2x8x8xf32>
    %181 = math.exp %180 : vector<2x8x8xf32>
    %cst_62 = arith.constant dense<0.000000e+00> : vector<2x8xf32>
    %182 = vector.multi_reduction <add>, %181, %cst_62 [2] : vector<2x8x8xf32> to vector<2x8xf32>
    %183 = vector.shape_cast %182 : vector<2x8xf32> to vector<2x8x1xf32>
    %184 = tpu.reciprocal %183 {approx = true} : vector<2x8x1xf32> -> vector<2x8x1xf32>
    %185 = vector.broadcast %184 : vector<2x8x1xf32> to vector<2x8x8xf32>
    %186 = arith.mulf %181, %185 : vector<2x8x8xf32>
    %187 = arith.truncf %186 : vector<2x8x8xf32> to vector<2x8x8xbf16>
    "tpu.trace_start"() <{level = 10 : i32, message = "bqk,bkd->bqd"}> : () -> ()
    %cst_63 = arith.constant dense<0.000000e+00> : vector<2x8x8xf32>
    %188 = tpu.matmul %187, %172, %cst_63 {dimension_numbers = #tpu.dot_dimension_numbers<[2], [1], [1], [2], [0, 0, 0, 1, 1, 2], [0], [0]>} : vector<2x8x8xbf16>, vector<2x8x8xbf16>, vector<2x8x8xf32> -> vector<2x8x8xf32>
    "tpu.trace_stop"() : () -> ()
    %189 = vector.extract_strided_slice %165 {offsets = [0, 0, 8], sizes = [2, 8, 8], strides = [1, 1, 1]} : vector<2x8x32xbf16> to vector<2x8x8xbf16>
    %190 = vector.extract_strided_slice %167 {offsets = [0, 0, 8], sizes = [2, 8, 8], strides = [1, 1, 1]} : vector<2x8x32xbf16> to vector<2x8x8xbf16>
    %191 = vector.extract_strided_slice %169 {offsets = [0, 0, 8], sizes = [2, 8, 8], strides = [1, 1, 1]} : vector<2x8x32xbf16> to vector<2x8x8xbf16>
    "tpu.trace_start"() <{level = 10 : i32, message = "bqd,bkd->bqk"}> : () -> ()
    %cst_64 = arith.constant dense<0.000000e+00> : vector<2x8x8xf32>
    %192 = tpu.matmul %189, %190, %cst_64 {dimension_numbers = #tpu.dot_dimension_numbers<[2], [2], [1], [1], [0, 0, 0, 1, 1, 1], [0], [0]>} : vector<2x8x8xbf16>, vector<2x8x8xbf16>, vector<2x8x8xf32> -> vector<2x8x8xf32>
    "tpu.trace_stop"() : () -> ()
    %cst_65 = arith.constant 0.353553385 : f32
    %193 = vector.broadcast %cst_65 : f32 to vector<2x8x8xf32>
    %194 = arith.mulf %192, %193 : vector<2x8x8xf32>
    %195 = arith.addf %194, %13 : vector<2x8x8xf32>
    %cst_66 = arith.constant dense<0xFF800000> : vector<2x8xf32>
    %196 = vector.multi_reduction <maximumf>, %195, %cst_66 [2] : vector<2x8x8xf32> to vector<2x8xf32>
    %197 = vector.shape_cast %196 : vector<2x8xf32> to vector<2x8x1xf32>
    %198 = vector.broadcast %197 : vector<2x8x1xf32> to vector<2x8x8xf32>
    %199 = arith.subf %195, %198 : vector<2x8x8xf32>
    %200 = math.exp %199 : vector<2x8x8xf32>
    %cst_67 = arith.constant dense<0.000000e+00> : vector<2x8xf32>
    %201 = vector.multi_reduction <add>, %200, %cst_67 [2] : vector<2x8x8xf32> to vector<2x8xf32>
    %202 = vector.shape_cast %201 : vector<2x8xf32> to vector<2x8x1xf32>
    %203 = tpu.reciprocal %202 {approx = true} : vector<2x8x1xf32> -> vector<2x8x1xf32>
    %204 = vector.broadcast %203 : vector<2x8x1xf32> to vector<2x8x8xf32>
    %205 = arith.mulf %200, %204 : vector<2x8x8xf32>
    %206 = arith.truncf %205 : vector<2x8x8xf32> to vector<2x8x8xbf16>
    "tpu.trace_start"() <{level = 10 : i32, message = "bqk,bkd->bqd"}> : () -> ()
    %cst_68 = arith.constant dense<0.000000e+00> : vector<2x8x8xf32>
    %207 = tpu.matmul %206, %191, %cst_68 {dimension_numbers = #tpu.dot_dimension_numbers<[2], [1], [1], [2], [0, 0, 0, 1, 1, 2], [0], [0]>} : vector<2x8x8xbf16>, vector<2x8x8xbf16>, vector<2x8x8xf32> -> vector<2x8x8xf32>
    "tpu.trace_stop"() : () -> ()
    %208 = vector.extract_strided_slice %165 {offsets = [0, 0, 16], sizes = [2, 8, 8], strides = [1, 1, 1]} : vector<2x8x32xbf16> to vector<2x8x8xbf16>
    %209 = vector.extract_strided_slice %167 {offsets = [0, 0, 16], sizes = [2, 8, 8], strides = [1, 1, 1]} : vector<2x8x32xbf16> to vector<2x8x8xbf16>
    %210 = vector.extract_strided_slice %169 {offsets = [0, 0, 16], sizes = [2, 8, 8], strides = [1, 1, 1]} : vector<2x8x32xbf16> to vector<2x8x8xbf16>
    "tpu.trace_start"() <{level = 10 : i32, message = "bqd,bkd->bqk"}> : () -> ()
    %cst_69 = arith.constant dense<0.000000e+00> : vector<2x8x8xf32>
    %211 = tpu.matmul %208, %209, %cst_69 {dimension_numbers = #tpu.dot_dimension_numbers<[2], [2], [1], [1], [0, 0, 0, 1, 1, 1], [0], [0]>} : vector<2x8x8xbf16>, vector<2x8x8xbf16>, vector<2x8x8xf32> -> vector<2x8x8xf32>
    "tpu.trace_stop"() : () -> ()
    %cst_70 = arith.constant 0.353553385 : f32
    %212 = vector.broadcast %cst_70 : f32 to vector<2x8x8xf32>
    %213 = arith.mulf %211, %212 : vector<2x8x8xf32>
    %214 = arith.addf %213, %13 : vector<2x8x8xf32>
    %cst_71 = arith.constant dense<0xFF800000> : vector<2x8xf32>
    %215 = vector.multi_reduction <maximumf>, %214, %cst_71 [2] : vector<2x8x8xf32> to vector<2x8xf32>
    %216 = vector.shape_cast %215 : vector<2x8xf32> to vector<2x8x1xf32>
    %217 = vector.broadcast %216 : vector<2x8x1xf32> to vector<2x8x8xf32>
    %218 = arith.subf %214, %217 : vector<2x8x8xf32>
    %219 = math.exp %218 : vector<2x8x8xf32>
    %cst_72 = arith.constant dense<0.000000e+00> : vector<2x8xf32>
    %220 = vector.multi_reduction <add>, %219, %cst_72 [2] : vector<2x8x8xf32> to vector<2x8xf32>
    %221 = vector.shape_cast %220 : vector<2x8xf32> to vector<2x8x1xf32>
    %222 = tpu.reciprocal %221 {approx = true} : vector<2x8x1xf32> -> vector<2x8x1xf32>
    %223 = vector.broadcast %222 : vector<2x8x1xf32> to vector<2x8x8xf32>
    %224 = arith.mulf %219, %223 : vector<2x8x8xf32>
    %225 = arith.truncf %224 : vector<2x8x8xf32> to vector<2x8x8xbf16>
    "tpu.trace_start"() <{level = 10 : i32, message = "bqk,bkd->bqd"}> : () -> ()
    %cst_73 = arith.constant dense<0.000000e+00> : vector<2x8x8xf32>
    %226 = tpu.matmul %225, %210, %cst_73 {dimension_numbers = #tpu.dot_dimension_numbers<[2], [1], [1], [2], [0, 0, 0, 1, 1, 2], [0], [0]>} : vector<2x8x8xbf16>, vector<2x8x8xbf16>, vector<2x8x8xf32> -> vector<2x8x8xf32>
    "tpu.trace_stop"() : () -> ()
    %227 = vector.extract_strided_slice %165 {offsets = [0, 0, 24], sizes = [2, 8, 8], strides = [1, 1, 1]} : vector<2x8x32xbf16> to vector<2x8x8xbf16>
    %228 = vector.extract_strided_slice %167 {offsets = [0, 0, 24], sizes = [2, 8, 8], strides = [1, 1, 1]} : vector<2x8x32xbf16> to vector<2x8x8xbf16>
    %229 = vector.extract_strided_slice %169 {offsets = [0, 0, 24], sizes = [2, 8, 8], strides = [1, 1, 1]} : vector<2x8x32xbf16> to vector<2x8x8xbf16>
    "tpu.trace_start"() <{level = 10 : i32, message = "bqd,bkd->bqk"}> : () -> ()
    %cst_74 = arith.constant dense<0.000000e+00> : vector<2x8x8xf32>
    %230 = tpu.matmul %227, %228, %cst_74 {dimension_numbers = #tpu.dot_dimension_numbers<[2], [2], [1], [1], [0, 0, 0, 1, 1, 1], [0], [0]>} : vector<2x8x8xbf16>, vector<2x8x8xbf16>, vector<2x8x8xf32> -> vector<2x8x8xf32>
    "tpu.trace_stop"() : () -> ()
    %cst_75 = arith.constant 0.353553385 : f32
    %231 = vector.broadcast %cst_75 : f32 to vector<2x8x8xf32>
    %232 = arith.mulf %230, %231 : vector<2x8x8xf32>
    %233 = arith.addf %232, %13 : vector<2x8x8xf32>
    %cst_76 = arith.constant dense<0xFF800000> : vector<2x8xf32>
    %234 = vector.multi_reduction <maximumf>, %233, %cst_76 [2] : vector<2x8x8xf32> to vector<2x8xf32>
    %235 = vector.shape_cast %234 : vector<2x8xf32> to vector<2x8x1xf32>
    %236 = vector.broadcast %235 : vector<2x8x1xf32> to vector<2x8x8xf32>
    %237 = arith.subf %233, %236 : vector<2x8x8xf32>
    %238 = math.exp %237 : vector<2x8x8xf32>
    %cst_77 = arith.constant dense<0.000000e+00> : vector<2x8xf32>
    %239 = vector.multi_reduction <add>, %238, %cst_77 [2] : vector<2x8x8xf32> to vector<2x8xf32>
    %240 = vector.shape_cast %239 : vector<2x8xf32> to vector<2x8x1xf32>
    %241 = tpu.reciprocal %240 {approx = true} : vector<2x8x1xf32> -> vector<2x8x1xf32>
    %242 = vector.broadcast %241 : vector<2x8x1xf32> to vector<2x8x8xf32>
    %243 = arith.mulf %238, %242 : vector<2x8x8xf32>
    %244 = arith.truncf %243 : vector<2x8x8xf32> to vector<2x8x8xbf16>
    "tpu.trace_start"() <{level = 10 : i32, message = "bqk,bkd->bqd"}> : () -> ()
    %cst_78 = arith.constant dense<0.000000e+00> : vector<2x8x8xf32>
    %245 = tpu.matmul %244, %229, %cst_78 {dimension_numbers = #tpu.dot_dimension_numbers<[2], [1], [1], [2], [0, 0, 0, 1, 1, 2], [0], [0]>} : vector<2x8x8xbf16>, vector<2x8x8xbf16>, vector<2x8x8xf32> -> vector<2x8x8xf32>
    "tpu.trace_stop"() : () -> ()
    %246 = tpu.concatenate %188, %207, %226, %245 in 2 : vector<2x8x8xf32>, vector<2x8x8xf32>, vector<2x8x8xf32>, vector<2x8x8xf32> -> vector<2x8x32xf32>
    %247 = vector.shape_cast %246 : vector<2x8x32xf32> to vector<16x32xf32>
    %248 = arith.truncf %247 : vector<16x32xf32> to vector<16x32xbf16>
    %cst_79 = arith.constant dense<0.000000e+00> : vector<16x32xf32>
    %249 = tpu.matmul %248, %157, %cst_79 {dimension_numbers = #tpu.dot_dimension_numbers<[1], [0], [0], [1], [0, 0, 1, 1], [], []>} : vector<16x32xbf16>, vector<32x32xbf16>, vector<16x32xf32> -> vector<16x32xf32>
    %250 = arith.addf %131, %249 : vector<16x32xf32>
    %251 = vector.extract_strided_slice %14 {offsets = [4, 0], sizes = [1, 32], strides = [1, 1]} : vector<6x32xf32> to vector<1x32xf32>
    %252 = vector.extract_strided_slice %14 {offsets = [5, 0], sizes = [1, 32], strides = [1, 1]} : vector<6x32xf32> to vector<1x32xf32>
    %cst_80 = arith.constant dense<0.000000e+00> : vector<16xf32>
    %253 = vector.multi_reduction <add>, %250, %cst_80 [1] : vector<16x32xf32> to vector<16xf32>
    %254 = vector.shape_cast %253 : vector<16xf32> to vector<16x1xf32>
    %cst_81 = arith.constant 3.200000e+01 : f32
    %255 = vector.broadcast %cst_81 : f32 to vector<16x1xf32>
    %256 = arith.divf %254, %255 : vector<16x1xf32>
    %257 = vector.broadcast %256 : vector<16x1xf32> to vector<16x32xf32>
    %258 = arith.subf %250, %257 : vector<16x32xf32>
    %259 = arith.mulf %258, %258 : vector<16x32xf32>
    %cst_82 = arith.constant dense<0.000000e+00> : vector<16xf32>
    %260 = vector.multi_reduction <add>, %259, %cst_82 [1] : vector<16x32xf32> to vector<16xf32>
    %261 = vector.shape_cast %260 : vector<16xf32> to vector<16x1xf32>
    %cst_83 = arith.constant 0.0322580636 : f32
    %262 = vector.broadcast %cst_83 : f32 to vector<16x1xf32>
    %263 = arith.mulf %261, %262 : vector<16x1xf32>
    %264 = math.sqrt %263 : vector<16x1xf32>
    %cst_84 = arith.constant 9.99999997E-7 : f32
    %265 = vector.broadcast %cst_84 : f32 to vector<16x1xf32>
    %266 = arith.addf %264, %265 : vector<16x1xf32>
    %267 = tpu.reciprocal %266 {approx = true} : vector<16x1xf32> -> vector<16x1xf32>
    %268 = vector.broadcast %251 : vector<1x32xf32> to vector<16x32xf32>
    %269 = arith.mulf %268, %258 : vector<16x32xf32>
    %270 = vector.broadcast %267 : vector<16x1xf32> to vector<16x32xf32>
    %271 = arith.mulf %269, %270 : vector<16x32xf32>
    %272 = vector.broadcast %252 : vector<1x32xf32> to vector<16x32xf32>
    %273 = arith.addf %271, %272 : vector<16x32xf32>
    %274 = arith.truncf %273 : vector<16x32xf32> to vector<16x32xbf16>
    %c0_85 = arith.constant 0 : index
    %c0_86 = arith.constant 0 : index
    %275 = vector.load %arg10[%c0_85, %c0_86] : memref<32x64xbf16, #tpu.memory_space<vmem>>, vector<32x64xbf16>
    %cst_87 = arith.constant dense<0.000000e+00> : vector<16x64xf32>
    %276 = tpu.matmul %274, %275, %cst_87 {dimension_numbers = #tpu.dot_dimension_numbers<[1], [0], [0], [1], [0, 0, 1, 1], [], []>} : vector<16x32xbf16>, vector<32x64xbf16>, vector<16x64xf32> -> vector<16x64xf32>
    %c0_88 = arith.constant 0 : index
    %c0_89 = arith.constant 0 : index
    %277 = vector.load %arg11[%c0_88, %c0_89] : memref<1x64xf32, #tpu.memory_space<vmem>>, vector<1x64xf32>
    %278 = vector.broadcast %277 : vector<1x64xf32> to vector<16x64xf32>
    %279 = arith.addf %276, %278 : vector<16x64xf32>
    %cst_90 = arith.constant 0.000000e+00 : f32
    %280 = vector.broadcast %cst_90 : f32 to vector<16x64xf32>
    %281 = arith.maximumf %279, %280 : vector<16x64xf32>
    %282 = arith.truncf %281 : vector<16x64xf32> to vector<16x64xbf16>
    %c0_91 = arith.constant 0 : index
    %c0_92 = arith.constant 0 : index
    %283 = vector.load %arg12[%c0_91, %c0_92] : memref<64x32xbf16, #tpu.memory_space<vmem>>, vector<64x32xbf16>
    %cst_93 = arith.constant dense<0.000000e+00> : vector<16x32xf32>
    %284 = tpu.matmul %282, %283, %cst_93 {dimension_numbers = #tpu.dot_dimension_numbers<[1], [0], [0], [1], [0, 0, 1, 1], [], []>} : vector<16x64xbf16>, vector<64x32xbf16>, vector<16x32xf32> -> vector<16x32xf32>
    %c0_94 = arith.constant 0 : index
    %c0_95 = arith.constant 0 : index
    %285 = vector.load %arg13[%c0_94, %c0_95] : memref<1x32xf32, #tpu.memory_space<vmem>>, vector<1x32xf32>
    %286 = vector.broadcast %285 : vector<1x32xf32> to vector<16x32xf32>
    %287 = arith.addf %284, %286 : vector<16x32xf32>
    %288 = arith.addf %250, %287 : vector<16x32xf32>
    %c0_96 = arith.constant 0 : index
    %c0_97 = arith.constant 0 : index
    %289 = vector.load %arg15[%c0_96, %c0_97] : memref<16x32xf32, #tpu.memory_space<vmem>>, vector<16x32xf32>
    tpu.vector_store %arg15[%c0_96, %c0_97], %288 {strides = array<i32>} : memref<16x32xf32, #tpu.memory_space<vmem>>, vector<16x32xf32>,
    return
  }
  func.func @transform_0(%arg0: i32) -> (i32, i32) {
    %c0_i32 = arith.constant 0 : i32
    %c0_i32_0 = arith.constant 0 : i32
    %c0_i32_1 = arith.constant 0 : i32
    return %c0_i32, %c0_i32_0 : i32, i32
  }
  func.func @transform_1(%arg0: i32) -> (i32, i32) {
    %c0_i32 = arith.constant 0 : i32
    %c0_i32_0 = arith.constant 0 : i32
    %c0_i32_1 = arith.constant 0 : i32
    return %c0_i32, %c0_i32_0 : i32, i32
  }
  func.func @transform_2(%arg0: i32) -> (i32, i32, i32) {
    %c0_i32 = arith.constant 0 : i32
    %c0_i32_0 = arith.constant 0 : i32
    %c0_i32_1 = arith.constant 0 : i32
    %c0_i32_2 = arith.constant 0 : i32
    return %c0_i32, %c0_i32_0, %c0_i32_1 : i32, i32, i32
  }
  func.func @transform_3(%arg0: i32) -> (i32, i32, i32) {
    %c0_i32 = arith.constant 0 : i32
    %c0_i32_0 = arith.constant 0 : i32
    %c0_i32_1 = arith.constant 0 : i32
    %c0_i32_2 = arith.constant 0 : i32
    return %c0_i32, %c0_i32_0, %c0_i32_1 : i32, i32, i32
  }
  func.func @transform_4(%arg0: i32) -> (i32, i32) {
    %c0_i32 = arith.constant 0 : i32
    %c0_i32_0 = arith.constant 0 : i32
    %c0_i32_1 = arith.constant 0 : i32
    return %c0_i32, %c0_i32_0 : i32, i32
  }
  func.func @transform_5(%arg0: i32) -> (i32, i32) {
    %c0_i32 = arith.constant 0 : i32
    %c0_i32_0 = arith.constant 0 : i32
    %c0_i32_1 = arith.constant 0 : i32
    return %c0_i32, %c0_i32_0 : i32, i32
  }
  func.func @transform_6(%arg0: i32) -> (i32, i32) {
    %c0_i32 = arith.constant 0 : i32
    %c0_i32_0 = arith.constant 0 : i32
    %c0_i32_1 = arith.constant 0 : i32
    return %c0_i32, %c0_i32_0 : i32, i32
  }
  func.func @transform_7(%arg0: i32) -> (i32, i32) {
    %c0_i32 = arith.constant 0 : i32
    %c0_i32_0 = arith.constant 0 : i32
    %c0_i32_1 = arith.constant 0 : i32
    return %c0_i32, %c0_i32_0 : i32, i32
  }
  func.func @transform_8(%arg0: i32) -> (i32, i32) {
    %c0_i32 = arith.constant 0 : i32
    %c0_i32_0 = arith.constant 0 : i32
    %c0_i32_1 = arith.constant 0 : i32
    return %c0_i32, %c0_i32_0 : i32, i32
  }
  func.func @transform_9(%arg0: i32) -> (i32, i32) {
    %c0_i32 = arith.constant 0 : i32
    %c0_i32_0 = arith.constant 0 : i32
    %c0_i32_1 = arith.constant 0 : i32
    return %c0_i32, %c0_i32_0 : i32, i32
  }
  func.func @transform_10(%arg0: i32) -> (i32, i32) {
    %c0_i32 = arith.constant 0 : i32
    %c0_i32_0 = arith.constant 0 : i32
    %c0_i32_1 = arith.constant 0 : i32
    return %c0_i32, %c0_i32_0 : i32, i32
  }
  func.func @transform_11(%arg0: i32) -> (i32, i32) {
    %c0_i32 = arith.constant 0 : i32
    %c0_i32_0 = arith.constant 0 : i32
    %c0_i32_1 = arith.constant 0 : i32
    return %c0_i32, %c0_i32_0 : i32, i32
  }
  func.func @transform_12(%arg0: i32) -> (i32, i32) {
    %c0_i32 = arith.constant 0 : i32
    %c0_i32_0 = arith.constant 0 : i32
    %c0_i32_1 = arith.constant 0 : i32
    return %c0_i32, %c0_i32_0 : i32, i32
  }
  func.func @transform_13(%arg0: i32) -> (i32, i32) {
    %c0_i32 = arith.constant 0 : i32
    %c0_i32_0 = arith.constant 0 : i32
    %c0_i32_1 = arith.constant 0 : i32
    return %c0_i32, %c0_i32_0 : i32, i32
  }
  func.func @transform_14(%arg0: i32) -> (i32, i32) {
    %c0_i32 = arith.constant 0 : i32
    %c0_i32_0 = arith.constant 0 : i32
    %c0_i32_1 = arith.constant 0 : i32
    return %c0_i32, %c0_i32_0 : i32, i32
  }
}

</mosaic_0001>

<bundles_post_ra>
// kernel: tpu_custom_call.1
= control target key start
LH: loop header
LB: loop body
LE: loop exit
PB: predicated region body
PF: predicated region fallthrough
CT: control target
= control target key end

     0   :  { %19 = vsyncpa [#allocation3], 0  ;;  %s2627_s0 = inlined_call_operand.vmem [shape: f32[16,32], index: 0, kind: input, shape index: {}]   ;;  %s2628_s1 = inlined_call_operand.vmem [shape: f32[16,32], index: 1, kind: input, shape index: {}]   ;;  %s2629_s2 = inlined_call_operand.vmem [shape: s32[2,8,8], index: 2, kind: input, shape index: {}]   ;;  %s2630_s3 = inlined_call_operand.hbm [shape: s32[2,8,8], index: 3, kind: input, shape index: {}]   ;;  %s2631_s4 = inlined_call_operand.hbm [shape: bf16[32,96], index: 4, kind: input, shape index: {}]   ;;  %s2632_s5 = inlined_call_operand.hbm [shape: bf16[32,32], index: 5, kind: input, shape index: {}]   ;;  %s2633_s6 = inlined_call_operand.hbm [shape: bf16[32,32], index: 6, kind: input, shape index: {}]   ;;  %s2634_s7 = inlined_call_operand.hbm [shape: bf16[32,64], index: 7, kind: input, shape index: {}]   ;;  %s2635_s8 = inlined_call_operand.hbm [shape: bf16[32,32], index: 8, kind: input, shape index: {}]   ;;  %s2636_s9 = inlined_call_operand.hbm [shape: bf16[32,64], index: 9, kind: input, shape index: {}]   ;;  %s2637_s10 = inlined_call_operand.vmem [shape: f32[1,64], index: 10, kind: input, shape index: {}]   ;;  %s2638_s11 = inlined_call_operand.vmem [shape: bf16[64,32], index: 11, kind: input, shape index: {}]   ;;  %s2639_s12 = inlined_call_operand.vmem [shape: f32[1,32], index: 12, kind: input, shape index: {}]   ;;  %s2640_s13 = inlined_call_operand.vmem [shape: f32[6,32], index: 13, kind: input, shape index: {}]   ;;  %s2641_s14 = inlined_call_operand.hbm [shape: f32[16,32], index: 14, kind: output, shape index: {}]  }
   0x1   :  { %20 = vsyncpa [#allocation6], 0 }
   0x2   :  { %21 = vsyncpa [#allocation9], 0 }
   0x3   :  { %22 = vsyncpa [#allocation12], 0  ;;  %s47_s15 = sshll.u32 %s2631_s4, 4  ;;  %s48_s15 = int_to_ptr.hbm [resolvable:$true] %s47_s15 }
   0x4   :  { %23 = vsyncpa [#allocation4], 0  ;;  %s2120_s16 = smov [#allocation5]   ;;  %s73_s20 = sshll.u32 %s2633_s6, 4  ;;  %s74_s20 = int_to_ptr.hbm [resolvable:$true] %s73_s20 }
   0x5   :  { %s49_s17 = sshll.u32 %s2120_s16, 4  ;;  %s2121_s21 = smov 64   ;;  %s50_s17 = int_to_ptr.vmem [resolvable:$true] %s49_s17 }
   0x6   :  { %s2122_s22 = smov 4   ;;  %s2123_s23 = smov [#allocation8]  }
   0x7   :  { %55 = dma.hbm_to_vmem [thread:$0]  %s48_s15, 256, %s50_s17, [#allocation6], %s2121_s21, %s2121_s21, %s2122_s22  }
   0x8   :  { %s75_s24 = sshll.u32 %s2123_s23, 4  ;;  %s99_s26 = sshll.u32 %s2635_s8, 4  ;;  %s76_s24 = int_to_ptr.vmem [resolvable:$true] %s75_s24  ;;  %s100_s26 = int_to_ptr.hbm [resolvable:$true] %s99_s26 }
   0x9   :  { %81 = dma.hbm_to_vmem [thread:$0]  %s74_s20, 256, %s76_s24, [#allocation9], %s2121_s21, %s2121_s21, %s2122_s22  }
   0xa   :  { %s34_s28 = sshll.u32 %s2630_s3, 4  ;;  %s2124_s29 = smov [#allocation11]   ;;  %s35_s28 = int_to_ptr.hbm [resolvable:$true] %s34_s28 }
   0xb   :  { %s101_s30 = sshll.u32 %s2124_s29, 4  ;;  %s2125_s15 = smov [#allocation2]   ;;  %s102_s30 = int_to_ptr.vmem [resolvable:$true] %s101_s30 }
   0xc   :  { %107 = dma.hbm_to_vmem [thread:$0]  %s100_s26, 256, %s102_s30, [#allocation12], %s2121_s21, %s2121_s21, %s2122_s22  }
   0xd   :  { %s36_s8 = sshll.u32 %s2125_s15, 4  ;;  %s2126_s16 = smov 128   ;;  %s37_s8 = int_to_ptr.vmem [resolvable:$true] %s36_s8 }
   0xe   :  { %s2127_s17 = smov 8   ;;  %s60_s3 = sshll.u32 %s2632_s5, 4  ;;  %s61_s3 = int_to_ptr.hbm [resolvable:$true] %s60_s3 }
   0xf   :  { %42 = dma.hbm_to_vmem [thread:$0]  %s35_s28, 256, %s37_s8, [#allocation3], %s2126_s16, %s2126_s16, %s2127_s17  }
  0x10   :  { %s2128_s20 = smov [#allocation7]   ;;  %s86_s4 = sshll.u32 %s2634_s7, 4  ;;  %s87_s4 = int_to_ptr.hbm [resolvable:$true] %s86_s4 }
  0x11   :  { %s62_s23 = sshll.u32 %s2128_s20, 4  ;;  %s2129_s26 = smov [#allocation10]   ;;  %s63_s23 = int_to_ptr.vmem [resolvable:$true] %s62_s23 }
  0x12   :  { %68 = dma.hbm_to_vmem [thread:$0]  %s61_s3, 256, %s63_s23, [#allocation6], %s2121_s21, %s2121_s21, %s2122_s22  }
  0x13   :  { %s88_s6 = sshll.u32 %s2129_s26, 4  ;;  %s112_s29 = sshll.u32 %s2636_s9, 4  ;;  %s89_s6 = int_to_ptr.vmem [resolvable:$true] %s88_s6  ;;  %s113_s29 = int_to_ptr.hbm [resolvable:$true] %s112_s29 }
  0x14   :  { %94 = dma.hbm_to_vmem [thread:$0]  %s87_s4, 256, %s89_s6, [#allocation9], %s2121_s21, %s2121_s21, %s2122_s22  }
  0x15   :  { %s2130_s5 = smov [#allocation13]  }
  0x16   :  { %s114_s30 = sshll.u32 %s2130_s5, 4  ;;  %s115_s30 = int_to_ptr.vmem [resolvable:$true] %s114_s30 }
  0x17   :  { %120 = dma.hbm_to_vmem [thread:$0]  %s113_s29, 256, %s115_s30, [#allocation12], %s2121_s21, %s2121_s21, %s2122_s22  }
  0x18   :  { %2110 = dma.done.wait [#allocation3], 256  }
  0x19   :  { %2111 = vsyncadd [#allocation3], 4294967040 }
  0x1a   :  { %2112 = dma.done.wait [#allocation6], 512  }
  0x1b   :  { %2113 = vsyncadd [#allocation6], 4294966784 }
  0x1c   :  { %2114 = dma.done.wait [#allocation9], 512  }
  0x1d   :  { %2115 = vsyncadd [#allocation9], 4294966784 }
  0x1e   :  { %2116 = dma.done.wait [#allocation12], 512  }
  0x1f   :  { %2117 = vsyncadd [#allocation12], 4294966784  ;;  %vm175_vm0 = vcmask 261120   ;;  %v2266_v0 = vld [vmem:[%s2627_s0] sm:$0xff]  ;;  %v2273_v2 = vld [vmem:[%s2627_s0 + $0x8] sm:$0xff]  ;;  %v2131_v4 = vmov 32.0  }
  0x20   :  { %v176_v1 = vsel %vm175_vm0, %v2266_v0, 0.0  ;;  %v179_v3 = vsel %vm175_vm0, %v2273_v2, 0.0  ;;  %1827 = vrcp.f32 %v2131_v4  ;;  %v1754_v21 = vld [vmem:[#allocation5 + $0x8] sm:$0xff]  ;;  %v1753_v22 = vld [vmem:[#allocation5] sm:$0xff]  ;;  %v2288_v46 = vld [vmem:[%s2640_s13] sm:$0x3f] }
  0x21   :  { %177 = vadd.xlane.f32.xlu0 %v176_v1  ;;  %269 = vmatpush.bf16.msra.mxu0 %v1754_v21  ;;  %v231_v50 = vperm.slane %v2288_v46, 0  ;;  %v236_v55 = vperm.slane %v2288_v46, 1  ;;  %s2132_s18 = smov 88   ;;  %s2133_s19 = smov 96   ;;  %vm284_vm6 = vcmask 64512   ;;  %vm361_vm9 = vcmask 1043456  }
  0x22   :  { %s2134_s3 = smov 80   ;;  %s2135_s20 = smov 72   ;;  %vm773_vm10 = vcmask 130048   ;;  %vm776_vm11 = vcmask 195584  }
  0x23   :  { %s2136_s23 = smov 112   ;;  %s2137_s24 = smov 120  }
  0x24   :  { %s2138_s25 = smov 104   ;;  %s2142_s28 = smov 40  }
  0x25   :  { %270 = vmatpush.bf16.msra.mxu0 %v1753_v22  ;;  %s2143_s29 = smov 16   ;;  %s2144_s5 = smov 24  }
  0x26   :  { %v1828_v5 = vpop.eup %1827 }
  0x27   :  { %v183_v6 = vmul.f32 32.0, %v1828_v5  ;;  %vm187_vm1 = vweird.f32 %v1828_v5 }
  0x29   :  { %180 = vadd.xlane.f32.xlu0 %v179_v3  ;;  %v184_v7 = vsub.f32 1.0, %v183_v6 }
  0x2b   :  { %v185_v8 = vmul.f32 %v1828_v5, %v184_v7 }
  0x2d   :  { %v186_v9 = vadd.f32 %v1828_v5, %v185_v8 }
  0x2f   :  { %v2277_v10 = vsel %vm187_vm1, %v1828_v5, %v186_v9 }
  0x94   :  { %v178_v11 = vpop.xlane.xlu0 %177 }
  0x95   :  { %v189_v12 = vmul.f32 %v2277_v10, %v178_v11 }
  0x97   :  { %v191_v13 = vsub.f32 %v2266_v0, %v189_v12 }
  0x99   :  { %v193_v14 = vmul.f32 %v191_v13, %v191_v13  ;;  %v232_v52 = vmul.f32 %v231_v50, %v191_v13 }
  0x9b   :  { %v195_v15 = vsel %vm175_vm0, %v193_v14, 0.0 }
  0x9c   :  { %196 = vadd.xlane.f32.xlu1 %v195_v15  ;;  %v181_v16 = vpop.xlane.xlu0 %180 }
  0x9d   :  { %v190_v17 = vmul.f32 %v2277_v10, %v181_v16 }
  0x9f   :  { %v192_v18 = vsub.f32 %v2273_v2, %v190_v17 }
  0xa1   :  { %v194_v19 = vmul.f32 %v192_v18, %v192_v18  ;;  %v233_v53 = vmul.f32 %v231_v50, %v192_v18 }
  0xa3   :  { %v198_v20 = vsel %vm175_vm0, %v194_v19, 0.0 }
  0xa4   :  { %199 = vadd.xlane.f32.xlu1 %v198_v20 }
 0x10f   :  { %v197_v23 = vpop.xlane.xlu1 %196 }
 0x110   :  { %v201_v24 = vmul.f32 0.032258064, %v197_v23 }
 0x112   :  { %1829 = vrsqrt.f32 %v201_v24  ;;  %vm210_vm2 = vcmp.eq.f32.partialorder %v201_v24, inf  ;;  %v213_v37 = vand.u32 2147483648, %v201_v24  ;;  %vm212_vm3 = vcmp.eq.f32.partialorder %v201_v24, 0.0 }
 0x117   :  { %v200_v25 = vpop.xlane.xlu1 %199 }
 0x118   :  { %v1830_v26 = vpop.eup %1829  ;;  %v202_v27 = vmul.f32 0.032258064, %v200_v25 }
 0x119   :  { %v204_v28 = vmul.f32 %v1830_v26, %v201_v24 }
 0x11a   :  { %1831 = vrsqrt.f32 %v202_v27  ;;  %vm222_vm4 = vcmp.eq.f32.partialorder %v202_v27, inf  ;;  %v225_v45 = vand.u32 2147483648, %v202_v27  ;;  %vm224_vm5 = vcmp.eq.f32.partialorder %v202_v27, 0.0 }
 0x11b   :  { %v205_v29 = vmul.f32 %v1830_v26, %v204_v28 }
 0x11d   :  { %v206_v30 = vmul.f32 0.5, %v205_v29 }
 0x11f   :  { %v207_v31 = vsub.f32 1.5, %v206_v30  ;;  %v162_v30 = vld [vmem:[%s2629_s2] sm:$0xff] }
 0x120   :  { %v1832_v32 = vpop.eup %1831  ;;  %vm164_vm7 = vcmp.eq.s32.totalorder %v162_v30, 0 }
 0x121   :  { %v216_v33 = vmul.f32 %v1832_v32, %v202_v27  ;;  %v208_v34 = vmul.f32 %v1830_v26, %v207_v31 }
 0x123   :  { %v217_v35 = vmul.f32 %v1832_v32, %v216_v33  ;;  %v209_v36 = vmul.f32 %v208_v34, %v201_v24 }
 0x125   :  { %v211_v38 = vsel %vm210_vm2, %v201_v24, %v209_v36  ;;  %v218_v39 = vmul.f32 0.5, %v217_v35 }
 0x126   :  { %v214_v40 = vsel %vm212_vm3, %v213_v37, %v211_v38  ;;  %v163_v38 = vld [vmem:[%s2629_s2 + $0x8] sm:$0xff]  ;;  %s2140_s2 = smov 56  }
 0x127   :  { %v219_v41 = vsub.f32 1.5, %v218_v39  ;;  %v227_v43 = vadd.f32 1e-06, %v214_v40  ;;  %vm165_vm8 = vcmp.eq.s32.totalorder %v163_v38, 0 }
 0x129   :  { %v220_v42 = vmul.f32 %v1832_v32, %v219_v41  ;;  %1833 = vrcp.f32 %v227_v43  ;;  %v2139_v32 = vmov 0.0  }
 0x12a   :  { %v166_v33 = vsel %vm164_vm7, -1e+09, %v2139_v32  ;;  %v167_v40 = vsel %vm165_vm8, -1e+09, %v2139_v32  ;;  %vm1606_vm7 = vcmask 523264  }
 0x12b   :  { %v221_v44 = vmul.f32 %v220_v42, %v202_v27 }
 0x12d   :  { %v223_v47 = vsel %vm222_vm4, %v202_v27, %v221_v44 }
 0x12e   :  { %v226_v48 = vsel %vm224_vm5, %v225_v45, %v223_v47 }
 0x12f   :  { %v228_v49 = vadd.f32 1e-06, %v226_v48  ;;  %v1834_v51 = vpop.eup %1833 }
 0x130   :  { %v234_v54 = vmul.f32 %v1834_v51, %v232_v52 }
 0x131   :  { %1835 = vrcp.f32 %v228_v49 }
 0x132   :  { %v237_v58 = vadd.f32 %v236_v55, %v234_v54 }
 0x137   :  { %v1836_v56 = vpop.eup %1835 }
 0x138   :  { %v235_v57 = vmul.f32 %v1836_v56, %v233_v53 }
 0x13a   :  { %v238_v59 = vadd.f32 %v236_v55, %v235_v57 }
 0x13c   :  { %v247_v60 = vpack.c.bf16 %v238_v59, %v237_v58 }
 0x13e   :  { %1658 = vmatmul.msk.bf16.vlgmr.msra.gmra.mxu0 %vm175_vm0, %v247_v60 }
 0x1bb   :  { %v272_v61 = vpop.f32.mrf.mxu0 }
 0x1bc   :  { %v277_v62 = vpack.c.bf16 %v272_v61, %v272_v61 }
 0x1be   :  { %v280_v63 = vunpack.c.l.b16 %v277_v62 }
 0x1c0   :  { %v2293_v1 = vpack.c.b16 %v280_v63, %v280_v63 }
 0x1c2   :  { %401 = vrot.lane.b32.xlu0 %v2293_v1, %s2132_s18  ;;  %282 = vrot.lane.b32.xlu2 %v2293_v1, %s2133_s19 }
 0x1c3   :  { %v274_v3 = vpop.f32.mrf.mxu0 }
 0x1c4   :  { %v278_v4 = vpack.c.bf16 %v274_v3, %v274_v3 }
 0x1c6   :  { %v305_v5 = vunpack.c.l.b16 %v278_v4 }
 0x1c8   :  { %v2299_v6 = vpack.c.b16 %v305_v5, %v305_v5 }
 0x1ca   :  { %540 = vrot.lane.b32.xlu0 %v2299_v6, %s2134_s3  ;;  %424 = vrot.lane.b32.xlu1 %v2299_v6, %s2132_s18 }
 0x1cb   :  { %307 = vrot.lane.b32.xlu2 %v2299_v6, %s2133_s19 }
 0x1d2   :  { %633 = vrot.lane.b32.xlu0 %v2293_v1, %s2135_s20  ;;  %538 = vrot.lane.b32.xlu1 %v2299_v6, %s2136_s23 }
 0x1d3   :  { %399 = vrot.lane.b32.xlu2 %v2293_v1, %s2137_s24 }
 0x1da   :  { %654 = vrot.lane.b32.xlu0 %v2299_v6, %s2138_s25  ;;  %631 = vrot.lane.b32.xlu1 %v2293_v1, %s2138_s25 }
 0x1db   :  { %422 = vrot.lane.b32.xlu2 %v2299_v6, %s2137_s24 }
 0x1e3   :  { %517 = vrot.lane.b32.xlu2 %v2293_v1, %s2134_s3 }
 0x1eb   :  { %515 = vrot.lane.b32.xlu2 %v2293_v1, %s2136_s23 }
 0x1f3   :  { %656 = vrot.lane.b32.xlu2 %v2299_v6, %s2135_s20 }
 0x21c   :  { %v283_v7 = vpop.permute.xlu2 %282 }
 0x21d   :  { %v289_v8 = vsel %vm284_vm6, %v283_v7, 0 }
 0x21e   :  { %298 = vmatpush.bf16.xpose.msra.mxu1 %v289_v8 }
 0x225   :  { %v308_v9 = vpop.permute.xlu2 %307  ;;  %1659 = vmatmul.msk.bf16.vlgmr.msra.gmra.mxu1 %vm284_vm6, %v277_v62 }
 0x226   :  { %v313_v11 = vsel %vm284_vm6, %v308_v9, 0 }
 0x227   :  { %322 = vmatpush.bf16.xpose.msra.mxu2 %v313_v11 }
 0x22d   :  { %v400_v12 = vpop.permute.xlu2 %399 }
 0x22e   :  { %1660 = vmatmul.msk.bf16.vlgmr.msra.gmra.mxu2 %vm284_vm6, %v278_v4 }
 0x234   :  { %v402_v13 = vpop.permute.xlu0 %401 }
 0x235   :  { %v423_v14 = vpop.permute.xlu2 %422  ;;  %v407_v15 = vsel %vm284_vm6, %v402_v13, 0 }
 0x236   :  { %416 = vmatpush.bf16.xpose.msrb.mxu0 %v407_v15 }
 0x23c   :  { %v541_v16 = vpop.permute.xlu0 %540  ;;  %v425_v17 = vpop.permute.xlu1 %424 }
 0x23d   :  { %v546_v18 = vsel %vm284_vm6, %v541_v16, 0  ;;  %v518_v19 = vpop.permute.xlu2 %517  ;;  %1663 = vmatmul.msk.bf16.vlgmr.msrb.gmra.mxu0 %vm284_vm6, %v400_v12  ;;  %v430_v20 = vsel %vm284_vm6, %v425_v17, 0 }
 0x23e   :  { %v523_v21 = vsel %vm284_vm6, %v518_v19, 0  ;;  %439 = vmatpush.bf16.xpose.msrb.mxu1 %v430_v20 }
 0x23f   :  { %532 = vmatpush.bf16.xpose.msra.mxu0 %v523_v21 }
 0x244   :  { %v634_v22 = vpop.permute.xlu0 %633  ;;  %v539_v27 = vpop.permute.xlu1 %538 }
 0x245   :  { %v639_v23 = vsel %vm284_vm6, %v634_v22, 0  ;;  %v516_v24 = vpop.permute.xlu2 %515  ;;  %1664 = vmatmul.msk.bf16.vlgmr.msrb.gmra.mxu1 %vm284_vm6, %v423_v14 }
 0x246   :  { %555 = vmatpush.bf16.xpose.msra.mxu1 %v546_v18 }
 0x247   :  { %648 = vmatpush.bf16.xpose.msrb.mxu0 %v639_v23 }
 0x24c   :  { %v632_v28 = vpop.permute.xlu1 %631  ;;  %v655_v29 = vpop.permute.xlu0 %654 }
 0x24d   :  { %v657_v25 = vpop.permute.xlu2 %656  ;;  %1667 = vmatmul.msk.bf16.vlgmr.msra.gmra.mxu0 %vm284_vm6, %v516_v24 }
 0x24e   :  { %v662_v26 = vsel %vm284_vm6, %v657_v25, 0 }
 0x24f   :  { %671 = vmatpush.bf16.xpose.msrb.mxu1 %v662_v26 }
 0x255   :  { %1668 = vmatmul.msk.bf16.vlgmr.msra.gmra.mxu1 %vm284_vm6, %v539_v27 }
 0x25d   :  { %1671 = vmatmul.msk.bf16.vlgmr.msrb.gmra.mxu0 %vm284_vm6, %v632_v28 }
 0x265   :  { %1672 = vmatmul.msk.bf16.vlgmr.msrb.gmra.mxu1 %vm284_vm6, %v655_v29 }
 0x2a2   :  { %v300_v31 = vpop.f32.mrf.mxu1 }
 0x2a3   :  { %v328_v34 = vmul.f32 0.35355338, %v300_v31 }
 0x2a5   :  { %v330_v35 = vadd.f32 %v328_v34, %v166_v33 }
 0x2a7   :  { %v332_v36 = vsel %vm284_vm6, %v330_v35, -inf }
 0x2a8   :  { %333 = vmax.xlane.f32.xlu2 %v332_v36 }
 0x2aa   :  { %v302_v37 = vpop.f32.mrf.mxu1 }
 0x2b1   :  { %v324_v39 = vpop.f32.mrf.mxu2 }
 0x2b2   :  { %v329_v41 = vmul.f32 0.35355338, %v324_v39 }
 0x2b4   :  { %v331_v42 = vadd.f32 %v329_v41, %v167_v40 }
 0x2b6   :  { %v335_v43 = vsel %vm284_vm6, %v331_v42, -inf }
 0x2b7   :  { %336 = vmax.xlane.f32.xlu1 %v335_v43 }
 0x2b9   :  { %v326_v44 = vpop.f32.mrf.mxu2 }
 0x2ba   :  { %v418_v45 = vpop.f32.mrf.mxu0 }
 0x2bb   :  { %v445_v47 = vmul.f32 0.35355338, %v418_v45 }
 0x2bd   :  { %v447_v48 = vadd.f32 %v445_v47, %v166_v33 }
 0x2bf   :  { %v449_v49 = vsel %vm284_vm6, %v447_v48, -inf }
 0x2c0   :  { %378 = vrot.lane.b32.xlu2 %v2299_v6, %s2121_s21  ;;  %450 = vmax.xlane.f32.xlu0 %v449_v49 }
 0x2c2   :  { %v420_v50 = vpop.f32.mrf.mxu0  ;;  %v441_v51 = vpop.f32.mrf.mxu1 }
 0x2c3   :  { %v446_v60 = vmul.f32 0.35355338, %v441_v51 }
 0x2c5   :  { %v448_v62 = vadd.f32 %v446_v60, %v167_v40 }
 0x2c7   :  { %v452_v3 = vsel %vm284_vm6, %v448_v62, -inf }
 0x2c8   :  { %494 = vrot.lane.b32.xlu2 %v2299_v6, %s2140_s2 }
 0x2ca   :  { %v443_v52 = vpop.f32.mrf.mxu1  ;;  %v534_v53 = vpop.f32.mrf.mxu0 }
 0x2cb   :  { %v561_v4 = vmul.f32 0.35355338, %v534_v53 }
 0x2cd   :  { %v563_v8 = vadd.f32 %v561_v4, %v166_v33 }
 0x2cf   :  { %v565_v11 = vsel %vm284_vm6, %v563_v8, -inf }
 0x2d0   :  { %356 = vrot.lane.b32.xlu1 %v2293_v1, %s2121_s21  ;;  %s2141_s21 = smov 48  }
 0x2d2   :  { %v536_v54 = vpop.f32.mrf.mxu0  ;;  %v557_v55 = vpop.f32.mrf.mxu1 }
 0x2d3   :  { %v562_v7 = vmul.f32 0.35355338, %v557_v55 }
 0x2d4   :  { %473 = vrot.lane.b32.xlu0 %v2293_v1, %s2140_s2  ;;  %s1634_s2 = sshll.u32 %s2641_s14, 4  ;;  %s1635_s2 = int_to_ptr.hbm [resolvable:$true] %s1634_s2 }
 0x2d5   :  { %v564_v12 = vadd.f32 %v562_v7, %v167_v40 }
 0x2d7   :  { %v568_v14 = vsel %vm284_vm6, %v564_v12, -inf }
 0x2da   :  { %v559_v56 = vpop.f32.mrf.mxu1  ;;  %v650_v57 = vpop.f32.mrf.mxu0 }
 0x2db   :  { %v677_v13 = vmul.f32 0.35355338, %v650_v57 }
 0x2dd   :  { %v679_v15 = vadd.f32 %v677_v13, %v166_v33 }
 0x2df   :  { %v681_v16 = vsel %vm284_vm6, %v679_v15, -inf }
 0x2e2   :  { %v652_v58 = vpop.f32.mrf.mxu0  ;;  %v673_v59 = vpop.f32.mrf.mxu1 }
 0x2e3   :  { %v678_v63 = vmul.f32 0.35355338, %v673_v59 }
 0x2e5   :  { %v2359_v5 = vadd.f32 %v678_v63, %v167_v40 }
 0x2e7   :  { %v684_v9 = vsel %vm284_vm6, %v2359_v5, -inf }
 0x2ea   :  { %v675_v61 = vpop.f32.mrf.mxu1 }
 0x2f1   :  { %453 = vmax.xlane.f32.xlu2 %v452_v3 }
 0x2f9   :  { %685 = vmax.xlane.f32.xlu2 %v684_v9 }
 0x2fa   :  { %566 = vmax.xlane.f32.xlu1 %v565_v11 }
 0x2fe   :  { %569 = vmax.xlane.f32.xlu0 %v568_v14 }
 0x306   :  { %682 = vmax.xlane.f32.xlu0 %v681_v16 }
 0x31b   :  { %v334_v17 = vpop.xlane.xlu2 %333 }
 0x31c   :  { %v338_v18 = vsub.f32 %v330_v35, %v334_v17 }
 0x31e   :  { %v340_v19 = vmul.f32 1.442695, %v338_v18 }
 0x320   :  { %1837 = vpow2.f32 %v340_v19 }
 0x323   :  { %v379_v30 = vpop.permute.xlu2 %378 }
 0x324   :  { %v384_v35 = vsel %vm361_vm9, %v379_v30, 0 }
 0x326   :  { %v2366_v20 = vpop.eup %1837 }
 0x327   :  { %v344_v21 = vsel %vm284_vm6, %v2366_v20, 0.0 }
 0x328   :  { %345 = vadd.xlane.f32.xlu2 %v344_v21 }
 0x32a   :  { %v337_v22 = vpop.xlane.xlu1 %336 }
 0x32b   :  { %v339_v25 = vsub.f32 %v331_v42, %v337_v22  ;;  %v495_v39 = vpop.permute.xlu2 %494 }
 0x32c   :  { %v500_v9 = vsel %vm361_vm9, %v495_v39, 0 }
 0x32d   :  { %v342_v27 = vmul.f32 1.442695, %v339_v25 }
 0x333   :  { %v451_v23 = vpop.xlane.xlu0 %450 }
 0x334   :  { %v455_v24 = vsub.f32 %v447_v48, %v451_v23 }
 0x336   :  { %v457_v26 = vmul.f32 1.442695, %v455_v24 }
 0x338   :  { %1839 = vpow2.f32 %v457_v26 }
 0x339   :  { %1841 = vpow2.f32 %v342_v27 }
 0x33e   :  { %v2370_v28 = vpop.eup %1839 }
 0x33f   :  { %v461_v29 = vsel %vm284_vm6, %v2370_v28, 0.0  ;;  %v2377_v34 = vpop.eup %1841 }
 0x340   :  { %462 = vadd.xlane.f32.xlu0 %v461_v29  ;;  %610 = vrot.lane.b32.xlu2 %v2299_v6, %s2141_s21  ;;  %v347_v38 = vsel %vm284_vm6, %v2377_v34, 0.0 }
 0x342   :  { %v357_v31 = vpop.permute.xlu1 %356 }
 0x343   :  { %v363_v33 = vsel %vm361_vm9, %v357_v31, 0 }
 0x344   :  { %372 = vmatpush.bf16.msra.mxu3 %v363_v33 }
 0x346   :  { %v474_v36 = vpop.permute.xlu0 %473 }
 0x347   :  { %v479_v37 = vsel %vm361_vm9, %v474_v36, 0 }
 0x348   :  { %393 = vmatpush.bf16.msrb.mxu3 %v384_v35  ;;  %488 = vmatpush.bf16.msrb.mxu2 %v479_v37 }
 0x349   :  { %348 = vadd.xlane.f32.xlu0 %v347_v38 }
 0x364   :  { %v454_v40 = vpop.xlane.xlu2 %453 }
 0x365   :  { %v456_v41 = vsub.f32 %v448_v62, %v454_v40 }
 0x367   :  { %v459_v42 = vmul.f32 1.442695, %v456_v41 }
 0x369   :  { %1843 = vpow2.f32 %v459_v42 }
 0x36c   :  { %v686_v61 = vpop.xlane.xlu2 %685 }
 0x36d   :  { %v567_v43 = vpop.xlane.xlu1 %566  ;;  %v688_v3 = vsub.f32 %v2359_v5, %v686_v61 }
 0x36e   :  { %v571_v44 = vsub.f32 %v563_v8, %v567_v43 }
 0x36f   :  { %v1844_v45 = vpop.eup %1843  ;;  %v691_v8 = vmul.f32 1.442695, %v688_v3 }
 0x370   :  { %v573_v47 = vmul.f32 1.442695, %v571_v44  ;;  %v464_v48 = vsel %vm284_vm6, %v1844_v45, 0.0 }
 0x371   :  { %v570_v49 = vpop.xlane.xlu0 %569  ;;  %465 = vadd.xlane.f32.xlu1 %v464_v48 }
 0x372   :  { %1845 = vpow2.f32 %v573_v47  ;;  %v572_v50 = vsub.f32 %v564_v12, %v570_v49 }
 0x374   :  { %v575_v51 = vmul.f32 1.442695, %v572_v50 }
 0x376   :  { %1847 = vpow2.f32 %v575_v51 }
 0x378   :  { %v2384_v52 = vpop.eup %1845 }
 0x379   :  { %v683_v53 = vpop.xlane.xlu0 %682  ;;  %v577_v54 = vsel %vm284_vm6, %v2384_v52, 0.0 }
 0x37a   :  { %v687_v55 = vsub.f32 %v679_v15, %v683_v53  ;;  %578 = vadd.xlane.f32.xlu2 %v577_v54 }
 0x37c   :  { %v1848_v56 = vpop.eup %1847  ;;  %v689_v57 = vmul.f32 1.442695, %v687_v55 }
 0x37d   :  { %v580_v58 = vsel %vm284_vm6, %v1848_v56, 0.0 }
 0x37e   :  { %1849 = vpow2.f32 %v689_v57  ;;  %581 = vadd.xlane.f32.xlu0 %v580_v58 }
 0x384   :  { %v2389_v59 = vpop.eup %1849 }
 0x385   :  { %v693_v60 = vsel %vm284_vm6, %v2389_v59, 0.0 }
 0x386   :  { %694 = vadd.xlane.f32.xlu0 %v693_v60 }
 0x38a   :  { %589 = vrot.lane.b32.xlu1 %v2293_v1, %s2141_s21 }
 0x392   :  { %726 = vrot.lane.b32.xlu2 %v2299_v6, %s2142_s28 }
 0x39a   :  { %705 = vrot.lane.b32.xlu0 %v2293_v1, %s2142_s28 }
 0x39b   :  { %v346_v62 = vpop.xlane.xlu2 %345 }
 0x39c   :  { %1851 = vrcp.f32 %v346_v62 }
 0x39d   :  { %1853 = vpow2.f32 %v691_v8  ;;  %v1756_v8 = vld [vmem:[#allocation7 + $0x8] sm:$0xff] }
 0x39e   :  { %801 = vmatpush.bf16.msra.mxu0 %v1756_v8 }
 0x3a2   :  { %v1852_v63 = vpop.eup %1851 }
 0x3a3   :  { %v352_v4 = vmul.f32 %v1852_v63, %v2366_v20  ;;  %v1854_v11 = vpop.eup %1853  ;;  %v611_v17 = vpop.permute.xlu2 %610 }
 0x3a4   :  { %v696_v12 = vsel %vm284_vm6, %v1854_v11, 0.0  ;;  %v616_v19 = vsel %vm361_vm9, %v611_v17, 0 }
 0x3a5   :  { %v354_v7 = vpack.c.bf16 %v352_v4, %v352_v4 }
 0x3a7   :  { %1661 = vmatmul.msk.bf16.vlgmr.msra.gmra.mxu3 %vm284_vm6, %v354_v7 }
 0x3a8   :  { %509 = vmatpush.bf16.msra.mxu3 %v500_v9  ;;  %v1755_v9 = vld [vmem:[#allocation7] sm:$0xff] }
 0x3a9   :  { %802 = vmatpush.bf16.msra.mxu0 %v1755_v9 }
 0x3b3   :  { %v463_v6 = vpop.xlane.xlu0 %462 }
 0x3b4   :  { %1855 = vrcp.f32 %v463_v6  ;;  %697 = vadd.xlane.f32.xlu1 %v696_v12 }
 0x3ba   :  { %v1856_v1 = vpop.eup %1855 }
 0x3bb   :  { %v469_v13 = vmul.f32 %v1856_v1, %v2370_v28 }
 0x3bc   :  { %v349_v5 = vpop.xlane.xlu0 %348 }
 0x3bd   :  { %1857 = vrcp.f32 %v349_v5  ;;  %v471_v14 = vpack.c.bf16 %v469_v13, %v469_v13 }
 0x3bf   :  { %1665 = vmatmul.msk.bf16.vlgmr.msrb.gmra.mxu2 %vm284_vm6, %v471_v14 }
 0x3c3   :  { %v1858_v15 = vpop.eup %1857 }
 0x3c4   :  { %v353_v16 = vmul.f32 %v1858_v15, %v2377_v34 }
 0x3c6   :  { %v355_v18 = vpack.c.bf16 %v353_v16, %v353_v16 }
 0x3c8   :  { %1662 = vmatmul.msk.bf16.vlgmr.msrb.gmra.mxu3 %vm284_vm6, %v355_v18 }
 0x3c9   :  { %625 = vmatpush.bf16.msrb.mxu3 %v616_v19 }
 0x3e4   :  { %v466_v20 = vpop.xlane.xlu1 %465 }
 0x3e5   :  { %1859 = vrcp.f32 %v466_v20 }
 0x3eb   :  { %v1860_v21 = vpop.eup %1859 }
 0x3ec   :  { %v470_v22 = vmul.f32 %v1860_v21, %v1844_v45 }
 0x3ed   :  { %v579_v23 = vpop.xlane.xlu2 %578 }
 0x3ee   :  { %v472_v24 = vpack.c.bf16 %v470_v22, %v470_v22  ;;  %1861 = vrcp.f32 %v579_v23 }
 0x3f0   :  { %1666 = vmatmul.msk.bf16.vlgmr.msra.gmra.mxu3 %vm284_vm6, %v472_v24 }
 0x3f1   :  { %v582_v25 = vpop.xlane.xlu0 %581 }
 0x3f2   :  { %1863 = vrcp.f32 %v582_v25 }
 0x3f4   :  { %v1862_v28 = vpop.eup %1861 }
 0x3f5   :  { %v727_v26 = vpop.permute.xlu2 %726  ;;  %v585_v31 = vmul.f32 %v1862_v28, %v2384_v52 }
 0x3f6   :  { %v732_v27 = vsel %vm361_vm9, %v727_v26, 0 }
 0x3f7   :  { %741 = vmatpush.bf16.msra.mxu3 %v732_v27  ;;  %v587_v36 = vpack.c.bf16 %v585_v31, %v585_v31 }
 0x3f8   :  { %v1864_v29 = vpop.eup %1863 }
 0x3f9   :  { %v586_v30 = vmul.f32 %v1864_v29, %v1848_v56  ;;  %v695_v37 = vpop.xlane.xlu0 %694 }
 0x3fa   :  { %1865 = vrcp.f32 %v695_v37 }
 0x3fb   :  { %v588_v35 = vpack.c.bf16 %v586_v30, %v586_v30 }
 0x3fc   :  { %v590_v33 = vpop.permute.xlu1 %589 }
 0x3fd   :  { %v595_v34 = vsel %vm361_vm9, %v590_v33, 0 }
 0x3fe   :  { %604 = vmatpush.bf16.msra.mxu2 %v595_v34 }
 0x400   :  { %1670 = vmatmul.msk.bf16.vlgmr.msrb.gmra.mxu3 %vm284_vm6, %v588_v35  ;;  %v1866_v38 = vpop.eup %1865 }
 0x401   :  { %1669 = vmatmul.msk.bf16.vlgmr.msra.gmra.mxu2 %vm284_vm6, %v587_v36  ;;  %v701_v39 = vmul.f32 %v1866_v38, %v2389_v59 }
 0x403   :  { %v703_v42 = vpack.c.bf16 %v701_v39, %v701_v39  ;;  %v1760_v39 = vld [vmem:[#allocation10 + $0x8] sm:$0xff] }
 0x40c   :  { %v706_v40 = vpop.permute.xlu0 %705 }
 0x40d   :  { %v711_v41 = vsel %vm361_vm9, %v706_v40, 0  ;;  %v1759_v40 = vld [vmem:[#allocation10] sm:$0xff] }
 0x40e   :  { %720 = vmatpush.bf16.msrb.mxu2 %v711_v41  ;;  %v160_v41 = vld [vmem:[%s2628_s1] sm:$0xff] }
 0x411   :  { %1673 = vmatmul.msk.bf16.vlgmr.msrb.gmra.mxu2 %vm284_vm6, %v703_v42  ;;  %v161_v42 = vld [vmem:[%s2628_s1 + $0x8] sm:$0xff] }
 0x412   :  { %931 = vmatpush.bf16.msra.mxu2 %v1760_v39 }
 0x416   :  { %932 = vmatpush.bf16.msra.mxu2 %v1759_v40 }
 0x427   :  { %v698_v43 = vpop.xlane.xlu1 %697 }
 0x428   :  { %1867 = vrcp.f32 %v698_v43  ;;  %v909_v43 = vpack.c.bf16 %v161_v42, %v160_v41 }
 0x42a   :  { %v374_v44 = vpop.f32.mrf.mxu3  ;;  %1701 = vmatmul.msk.bf16.vlgmr.msra.gmra.mxu2 %vm175_vm0, %v909_v43 }
 0x42e   :  { %v1868_v45 = vpop.eup %1867 }
 0x42f   :  { %v702_v47 = vmul.f32 %v1868_v45, %v1854_v11 }
 0x431   :  { %v704_v48 = vpack.c.bf16 %v702_v47, %v702_v47  ;;  %v1757_v47 = vld [vmem:[#allocation8] sm:$0xff] }
 0x432   :  { %v376_v49 = vpop.f32.mrf.mxu3 }
 0x433   :  { %1674 = vmatmul.msk.bf16.vlgmr.msra.gmra.mxu3 %vm284_vm6, %v704_v48 }
 0x442   :  { %v490_v50 = vpop.f32.mrf.mxu2 }
 0x44a   :  { %v492_v52 = vpop.f32.mrf.mxu2 }
 0x44b   :  { %v395_v51 = vpop.f32.mrf.mxu3 }
 0x453   :  { %v397_v53 = vpop.f32.mrf.mxu3 }
 0x473   :  { %v511_v54 = vpop.f32.mrf.mxu3 }
 0x474   :  { %v1795_v55 = vpack.i.bf16 %v511_v54, %v490_v50 }
 0x476   :  { %1796 = vrot.lane.b32.xlu0 %v1795_v55, %s2127_s17 }
 0x47b   :  { %v513_v56 = vpop.f32.mrf.mxu3 }
 0x483   :  { %v627_v57 = vpop.f32.mrf.mxu3 }
 0x484   :  { %v606_v58 = vpop.f32.mrf.mxu2 }
 0x485   :  { %v1800_v59 = vpack.i.bf16 %v627_v57, %v606_v58 }
 0x487   :  { %1801 = vrot.lane.b32.xlu2 %v1800_v59, %s2143_s29 }
 0x48b   :  { %v629_v60 = vpop.f32.mrf.mxu3 }
 0x48c   :  { %v608_v61 = vpop.f32.mrf.mxu2 }
 0x494   :  { %v722_v62 = vpop.f32.mrf.mxu2 }
 0x49c   :  { %v724_v63 = vpop.f32.mrf.mxu2 }
 0x4b6   :  { %v743_v3 = vpop.f32.mrf.mxu3 }
 0x4b7   :  { %v1805_v4 = vpack.i.bf16 %v743_v3, %v722_v62 }
 0x4b9   :  { %1806 = vrot.lane.b32.xlu0 %v1805_v4, %s2144_s5 }
 0x4be   :  { %v745_v7 = vpop.f32.mrf.mxu3 }
 0x4e1   :  { %v1802_v1 = vpop.permute.xlu2 %1801 }
 0x4e2   :  { %v1804_v14 = vunpack.i.h.bf16 %v1802_v1  ;;  %v1803_v15 = vunpack.i.l.bf16 %v1802_v1 }
 0x4e8   :  { %v1797_v11 = vpop.permute.xlu0 %1796 }
 0x4e9   :  { %v1799_v6 = vunpack.i.h.bf16 %v1797_v11  ;;  %v1798_v12 = vunpack.i.l.bf16 %v1797_v11 }
 0x4eb   :  { %v772_v13 = vsel %vm284_vm6, %v395_v51, %v1799_v6  ;;  %v771_v5 = vsel %vm284_vm6, %v374_v44, %v1798_v12  ;;  %v1758_v44 = vld [vmem:[#allocation8 + $0x8] sm:$0xff] }
 0x4ec   :  { %v774_v19 = vsel %vm773_vm10, %v771_v5, %v1803_v15  ;;  %v775_v20 = vsel %vm773_vm10, %v772_v13, %v1804_v14  ;;  %901 = vmatpush.bf16.msra.mxu1 %v1758_v44  ;;  %v859_v13 = vperm.slane %v2288_v46, 2 }
 0x4f0   :  { %902 = vmatpush.bf16.msra.mxu1 %v1757_v47 }
 0x52b   :  { %v1807_v16 = vpop.permute.xlu0 %1806 }
 0x52c   :  { %v1809_v17 = vunpack.i.h.bf16 %v1807_v16  ;;  %v1808_v18 = vunpack.i.l.bf16 %v1807_v16 }
 0x52e   :  { %v777_v21 = vsel %vm776_vm11, %v774_v19, %v1808_v18  ;;  %v778_v22 = vsel %vm776_vm11, %v775_v20, %v1809_v17  ;;  %v864_v17 = vperm.slane %v2288_v46, 3 }
 0x52f   :  { %v779_v23 = vpack.c.bf16 %v778_v22, %v777_v21 }
 0x531   :  { %1683 = vmatmul.msk.bf16.vlgmr.msra.gmra.mxu0 %vm175_vm0, %v779_v23  ;;  %v934_v23 = vpop.f32.mrf.mxu2 }
 0x5ae   :  { %v804_v24 = vpop.f32.mrf.mxu0 }
 0x5af   :  { %v2428_v25 = vadd.f32 %v804_v24, %v2266_v0  ;;  %v941_v24 = vpack.c.bf16 %v934_v23, %v934_v23 }
 0x5b1   :  { %v811_v26 = vsel %vm175_vm0, %v2428_v25, 0.0 }
 0x5b2   :  { %812 = vadd.xlane.f32.xlu2 %v811_v26  ;;  %v947_v26 = vsel %vm284_vm6, %v941_v24, 0 }
 0x5b3   :  { %956 = vmatpush.bf16.xpose.msrb.mxu3 %v947_v26 }
 0x5b6   :  { %v806_v27 = vpop.f32.mrf.mxu0 }
 0x5b7   :  { %v2433_v28 = vadd.f32 %v806_v27, %v2273_v2  ;;  %v1010_v27 = vunpack.c.l.b16 %v941_v24 }
 0x5b9   :  { %v814_v29 = vsel %vm175_vm0, %v2433_v28, 0.0 }
 0x5ba   :  { %815 = vadd.xlane.f32.xlu0 %v814_v29  ;;  %v2454_v29 = vpack.c.b16 %v1010_v27, %v1010_v27 }
 0x625   :  { %v813_v30 = vpop.xlane.xlu2 %812 }
 0x626   :  { %v817_v31 = vmul.f32 %v813_v30, %v2277_v10  ;;  %v936_v30 = vpop.f32.mrf.mxu2 }
 0x627   :  { %v942_v46 = vpack.c.bf16 %v936_v30, %v936_v30 }
 0x628   :  { %v819_v33 = vsub.f32 %v2428_v25, %v817_v31 }
 0x629   :  { %v966_v31 = vsel %vm284_vm6, %v942_v46, 0 }
 0x62a   :  { %v821_v34 = vmul.f32 %v819_v33, %v819_v33  ;;  %v860_v14 = vmul.f32 %v859_v13, %v819_v33  ;;  %v1034_v33 = vunpack.c.l.b16 %v942_v46  ;;  %975 = vmatpush.bf16.xpose.msrb.mxu0 %v966_v31 }
 0x62c   :  { %v823_v0 = vsel %vm175_vm0, %v821_v34, 0.0  ;;  %v2459_v34 = vpack.c.b16 %v1034_v33, %v1034_v33 }
 0x62d   :  { %824 = vadd.xlane.f32.xlu1 %v823_v0  ;;  %v816_v35 = vpop.xlane.xlu0 %815 }
 0x62e   :  { %v818_v36 = vmul.f32 %v816_v35, %v2277_v10  ;;  %1088 = vrot.lane.b32.xlu2 %v2459_v34, %s2137_s24 }
 0x630   :  { %v820_v37 = vsub.f32 %v2433_v28, %v818_v36 }
 0x632   :  { %v822_v2 = vmul.f32 %v820_v37, %v820_v37  ;;  %v861_v15 = vmul.f32 %v859_v13, %v820_v37 }
 0x634   :  { %v826_v38 = vsel %vm175_vm0, %v822_v2, 0.0 }
 0x635   :  { %827 = vadd.xlane.f32.xlu1 %v826_v38 }
 0x64e   :  { %1062 = vrot.lane.b32.xlu1 %v2454_v29, %s2137_s24 }
 0x656   :  { %1181 = vrot.lane.b32.xlu1 %v2454_v29, %s2136_s23 }
 0x688   :  { %v1089_v41 = vpop.permute.xlu2 %1088 }
 0x689   :  { %v1094_v42 = vsel %vm284_vm6, %v1089_v41, 0 }
 0x68a   :  { %1103 = vmatpush.bf16.xpose.msra.mxu0 %v1094_v42 }
 0x6a0   :  { %v825_v45 = vpop.xlane.xlu1 %824 }
 0x6a1   :  { %v829_v48 = vmul.f32 0.032258064, %v825_v45 }
 0x6a3   :  { %1869 = vrsqrt.f32 %v829_v48  ;;  %vm838_vm12 = vcmp.eq.f32.partialorder %v829_v48, inf  ;;  %v841_v61 = vand.u32 2147483648, %v829_v48  ;;  %vm840_vm13 = vcmp.eq.f32.partialorder %v829_v48, 0.0 }
 0x6a8   :  { %v828_v49 = vpop.xlane.xlu1 %827 }
 0x6a9   :  { %v1870_v50 = vpop.eup %1869  ;;  %v830_v51 = vmul.f32 0.032258064, %v828_v49 }
 0x6aa   :  { %v832_v52 = vmul.f32 %v1870_v50, %v829_v48 }
 0x6ab   :  { %1871 = vrsqrt.f32 %v830_v51  ;;  %vm850_vm14 = vcmp.eq.f32.partialorder %v830_v51, inf  ;;  %v853_v11 = vand.u32 2147483648, %v830_v51  ;;  %vm852_vm15 = vcmp.eq.f32.partialorder %v830_v51, 0.0 }
 0x6ac   :  { %v833_v53 = vmul.f32 %v1870_v50, %v832_v52 }
 0x6ae   :  { %v834_v54 = vmul.f32 0.5, %v833_v53  ;;  %v169_v53 = vld [vmem:[#allocation2 + $0x8] sm:$0xff] }
 0x6af   :  { %vm171_vm2 = vcmp.eq.s32.totalorder %v169_v53, 0 }
 0x6b0   :  { %v835_v55 = vsub.f32 1.5, %v834_v54 }
 0x6b1   :  { %v1872_v56 = vpop.eup %1871 }
 0x6b2   :  { %v836_v57 = vmul.f32 %v1870_v50, %v835_v55  ;;  %v844_v58 = vmul.f32 %v1872_v56, %v830_v51  ;;  %v168_v50 = vld [vmem:[#allocation2] sm:$0xff] }
 0x6b3   :  { %vm170_vm1 = vcmp.eq.s32.totalorder %v168_v50, 0 }
 0x6b4   :  { %v837_v59 = vmul.f32 %v836_v57, %v829_v48  ;;  %v845_v60 = vmul.f32 %v1872_v56, %v844_v58  ;;  %v2487_v55 = vsel %vm170_vm1, -1e+09, %v2139_v32  ;;  %v2490_v58 = vsel %vm171_vm2, -1e+09, %v2139_v32 }
 0x6b6   :  { %v839_v62 = vsel %vm838_vm12, %v829_v48, %v837_v59  ;;  %v846_v63 = vmul.f32 0.5, %v845_v60 }
 0x6b7   :  { %v842_v3 = vsel %vm840_vm13, %v841_v61, %v839_v62 }
 0x6b8   :  { %v847_v4 = vsub.f32 1.5, %v846_v63  ;;  %v855_v8 = vadd.f32 1e-06, %v842_v3 }
 0x6ba   :  { %v848_v7 = vmul.f32 %v1872_v56, %v847_v4  ;;  %1873 = vrcp.f32 %v855_v8 }
 0x6bc   :  { %v849_v9 = vmul.f32 %v848_v7, %v830_v51 }
 0x6be   :  { %v851_v6 = vsel %vm850_vm14, %v830_v51, %v849_v9 }
 0x6bf   :  { %v854_v12 = vsel %vm852_vm15, %v853_v11, %v851_v6 }
 0x6c0   :  { %v856_v1 = vadd.f32 1e-06, %v854_v12  ;;  %v1874_v5 = vpop.eup %1873  ;;  %v1063_v43 = vpop.permute.xlu1 %1062 }
 0x6c1   :  { %v862_v16 = vmul.f32 %v1874_v5, %v860_v14  ;;  %v1068_v44 = vsel %vm284_vm6, %v1063_v43, 0 }
 0x6c2   :  { %1875 = vrcp.f32 %v856_v1  ;;  %1077 = vmatpush.bf16.xpose.msra.mxu3 %v1068_v44 }
 0x6c3   :  { %v865_v20 = vadd.f32 %v864_v17, %v862_v16 }
 0x6c8   :  { %v1876_v18 = vpop.eup %1875  ;;  %v1182_v45 = vpop.permute.xlu1 %1181 }
 0x6c9   :  { %v863_v19 = vmul.f32 %v1876_v18, %v861_v15  ;;  %v1187_v47 = vsel %vm284_vm6, %v1182_v45, 0 }
 0x6cb   :  { %v866_v21 = vadd.f32 %v864_v17, %v863_v19 }
 0x6cd   :  { %v879_v22 = vpack.c.bf16 %v866_v21, %v865_v20 }
 0x6cf   :  { %1692 = vmatmul.msk.bf16.vlgmr.msra.gmra.mxu1 %vm175_vm0, %v879_v22 }
 0x74c   :  { %v904_v0 = vpop.f32.mrf.mxu1 }
 0x74d   :  { %v939_v35 = vpack.c.bf16 %v904_v0, %v904_v0 }
 0x74f   :  { %v1058_v36 = vunpack.c.l.b16 %v939_v35  ;;  %1702 = vmatmul.msk.bf16.vlgmr.msrb.gmra.mxu3 %vm284_vm6, %v939_v35 }
 0x750   :  { %1196 = vmatpush.bf16.xpose.msrb.mxu3 %v1187_v47 }
 0x751   :  { %v1059_v37 = vpack.c.b16 %v1058_v36, %v1058_v36 }
 0x753   :  { %1179 = vrot.lane.b32.xlu2 %v1059_v37, %s2136_s23  ;;  %1060 = vrot.lane.b32.xlu0 %v1059_v37, %s2137_s24 }
 0x754   :  { %v906_v2 = vpop.f32.mrf.mxu1 }
 0x755   :  { %v940_v38 = vpack.c.bf16 %v906_v2, %v906_v2 }
 0x757   :  { %v1084_v39 = vunpack.c.l.b16 %v940_v38  ;;  %1703 = vmatmul.msk.bf16.vlgmr.msrb.gmra.mxu0 %vm284_vm6, %v940_v38 }
 0x759   :  { %v1085_v40 = vpack.c.b16 %v1084_v39, %v1084_v39 }
 0x75b   :  { %1320 = vrot.lane.b32.xlu2 %v2459_v34, %s2138_s25  ;;  %1202 = vrot.lane.b32.xlu0 %v1085_v40, %s2136_s23 }
 0x75c   :  { %1086 = vrot.lane.b32.xlu1 %v1085_v40, %s2137_s24 }
 0x763   :  { %1295 = vrot.lane.b32.xlu0 %v1059_v37, %s2138_s25 }
 0x764   :  { %1204 = vrot.lane.b32.xlu1 %v2459_v34, %s2136_s23 }
 0x76b   :  { %1036 = vrot.lane.b32.xlu0 %v2459_v34, %s2133_s19 }
 0x76c   :  { %1297 = vrot.lane.b32.xlu1 %v2454_v29, %s2138_s25 }
 0x774   :  { %1318 = vrot.lane.b32.xlu1 %v1085_v40, %s2138_s25 }
 0x7ad   :  { %v1180_v49 = vpop.permute.xlu2 %1179 }
 0x7b5   :  { %v1321_v59 = vpop.permute.xlu2 %1320 }
 0x7b6   :  { %v1326_v8 = vsel %vm284_vm6, %v1321_v59, 0 }
 0x7c5   :  { %v1061_v48 = vpop.permute.xlu0 %1060 }
 0x7c6   :  { %1706 = vmatmul.msk.bf16.vlgmr.msra.gmra.mxu3 %vm284_vm6, %v1061_v48 }
 0x7cd   :  { %v1203_v51 = vpop.permute.xlu0 %1202 }
 0x7ce   :  { %v1087_v52 = vpop.permute.xlu1 %1086 }
 0x7cf   :  { %1707 = vmatmul.msk.bf16.vlgmr.msra.gmra.mxu0 %vm284_vm6, %v1087_v52 }
 0x7d2   :  { %v958_v54 = vpop.f32.mrf.mxu3 }
 0x7d3   :  { %v981_v56 = vmul.f32 0.35355338, %v958_v54 }
 0x7d4   :  { %v977_v57 = vpop.f32.mrf.mxu0 }
 0x7d5   :  { %v982_v60 = vmul.f32 0.35355338, %v977_v57  ;;  %v1296_v61 = vpop.permute.xlu0 %1295  ;;  %v983_v62 = vadd.f32 %v981_v56, %v2487_v55 }
 0x7d6   :  { %v1205_v63 = vpop.permute.xlu1 %1204  ;;  %1710 = vmatmul.msk.bf16.vlgmr.msrb.gmra.mxu3 %vm284_vm6, %v1180_v49 }
 0x7d7   :  { %v1210_v3 = vsel %vm284_vm6, %v1205_v63, 0  ;;  %v985_v4 = vsel %vm284_vm6, %v983_v62, -inf  ;;  %v984_v7 = vadd.f32 %v982_v60, %v2490_v58 }
 0x7d8   :  { %1219 = vmatpush.bf16.xpose.msrb.mxu0 %v1210_v3  ;;  %986 = vmax.xlane.f32.xlu0 %v985_v4 }
 0x7d9   :  { %v988_v32 = vsel %vm284_vm6, %v984_v7, -inf }
 0x7da   :  { %v960_v9 = vpop.f32.mrf.mxu3  ;;  %989 = vmax.xlane.f32.xlu2 %v988_v32 }
 0x7dc   :  { %v979_v11 = vpop.f32.mrf.mxu0 }
 0x7dd   :  { %v1037_v6 = vpop.permute.xlu0 %1036 }
 0x7de   :  { %v1042_v12 = vsel %vm361_vm9, %v1037_v6, 0  ;;  %v1298_v1 = vpop.permute.xlu1 %1297 }
 0x7df   :  { %v1303_v13 = vsel %vm284_vm6, %v1298_v1, 0  ;;  %1711 = vmatmul.msk.bf16.vlgmr.msrb.gmra.mxu0 %vm284_vm6, %v1203_v51  ;;  %1051 = vmatpush.bf16.msrb.mxu2 %v1042_v12 }
 0x7e0   :  { %1335 = vmatpush.bf16.xpose.msra.mxu0 %v1326_v8  ;;  %1312 = vmatpush.bf16.xpose.msra.mxu3 %v1303_v13 }
 0x7e6   :  { %v1319_v5 = vpop.permute.xlu1 %1318 }
 0x7e7   :  { %1714 = vmatmul.msk.bf16.vlgmr.msra.gmra.mxu3 %vm284_vm6, %v1296_v61 }
 0x7ef   :  { %1715 = vmatmul.msk.bf16.vlgmr.msra.gmra.mxu0 %vm284_vm6, %v1319_v5 }
 0x849   :  { %v1079_v14 = vpop.f32.mrf.mxu3 }
 0x84a   :  { %v1109_v15 = vmul.f32 0.35355338, %v1079_v14 }
 0x84b   :  { %v987_v16 = vpop.xlane.xlu0 %986 }
 0x84c   :  { %v991_v17 = vsub.f32 %v983_v62, %v987_v16  ;;  %v1105_v18 = vpop.f32.mrf.mxu0  ;;  %v1111_v19 = vadd.f32 %v1109_v15, %v2487_v55 }
 0x84d   :  { %v1110_v20 = vmul.f32 0.35355338, %v1105_v18  ;;  %v990_v21 = vpop.xlane.xlu2 %989 }
 0x84e   :  { %v993_v22 = vmul.f32 1.442695, %v991_v17  ;;  %v992_v23 = vsub.f32 %v984_v7, %v990_v21  ;;  %v1113_v24 = vsel %vm284_vm6, %v1111_v19, -inf }
 0x84f   :  { %1114 = vmax.xlane.f32.xlu2 %v1113_v24  ;;  %v1112_v26 = vadd.f32 %v1110_v20, %v2490_v58 }
 0x850   :  { %1877 = vpow2.f32 %v993_v22  ;;  %v995_v27 = vmul.f32 1.442695, %v992_v23 }
 0x851   :  { %v1081_v30 = vpop.f32.mrf.mxu3  ;;  %v1116_v46 = vsel %vm284_vm6, %v1112_v26, -inf }
 0x852   :  { %1879 = vpow2.f32 %v995_v27  ;;  %1117 = vmax.xlane.f32.xlu1 %v1116_v46 }
 0x854   :  { %v1107_v31 = vpop.f32.mrf.mxu0 }
 0x856   :  { %v2508_v33 = vpop.eup %1877 }
 0x857   :  { %v997_v0 = vsel %vm284_vm6, %v2508_v33, 0.0 }
 0x858   :  { %v1880_v35 = vpop.eup %1879  ;;  %998 = vadd.xlane.f32.xlu2 %v997_v0 }
 0x859   :  { %v1198_v36 = vpop.f32.mrf.mxu3  ;;  %v1000_v37 = vsel %vm284_vm6, %v1880_v35, 0.0 }
 0x85a   :  { %v1225_v2 = vmul.f32 0.35355338, %v1198_v36  ;;  %1001 = vadd.xlane.f32.xlu0 %v1000_v37 }
 0x85c   :  { %v1221_v38 = vpop.f32.mrf.mxu0  ;;  %v1227_v39 = vadd.f32 %v1225_v2, %v2487_v55 }
 0x85d   :  { %v1226_v40 = vmul.f32 0.35355338, %v1221_v38 }
 0x85e   :  { %v1229_v41 = vsel %vm284_vm6, %v1227_v39, -inf }
 0x85f   :  { %1230 = vmax.xlane.f32.xlu1 %v1229_v41  ;;  %v1228_v42 = vadd.f32 %v1226_v40, %v2490_v58 }
 0x861   :  { %v1200_v43 = vpop.f32.mrf.mxu3  ;;  %v1232_v44 = vsel %vm284_vm6, %v1228_v42, -inf }
 0x862   :  { %1233 = vmax.xlane.f32.xlu0 %v1232_v44 }
 0x864   :  { %v1223_v45 = vpop.f32.mrf.mxu0 }
 0x86a   :  { %v1314_v47 = vpop.f32.mrf.mxu3 }
 0x86b   :  { %v1341_v48 = vmul.f32 0.35355338, %v1314_v47 }
 0x86c   :  { %v1337_v49 = vpop.f32.mrf.mxu0 }
 0x86d   :  { %v1343_v50 = vadd.f32 %v1341_v48, %v2487_v55  ;;  %v1342_v54 = vmul.f32 0.35355338, %v1337_v49 }
 0x86f   :  { %v1345_v51 = vsel %vm284_vm6, %v1343_v50, -inf  ;;  %v2528_v55 = vadd.f32 %v1342_v54, %v2490_v58 }
 0x870   :  { %1346 = vmax.xlane.f32.xlu1 %v1345_v51  ;;  %1137 = vrot.lane.b32.xlu2 %v2454_v29, %s2132_s18 }
 0x871   :  { %v1348_v56 = vsel %vm284_vm6, %v2528_v55, -inf }
 0x872   :  { %v1316_v52 = vpop.f32.mrf.mxu3 }
 0x874   :  { %v1339_v53 = vpop.f32.mrf.mxu0 }
 0x876   :  { %1158 = vrot.lane.b32.xlu0 %v2459_v34, %s2132_s18 }
 0x878   :  { %1274 = vrot.lane.b32.xlu2 %v2459_v34, %s2134_s3 }
 0x889   :  { %1012 = vrot.lane.b32.xlu1 %v2454_v29, %s2133_s19 }
 0x8a1   :  { %1349 = vmax.xlane.f32.xlu2 %v1348_v56 }
 0x8c2   :  { %v1115_v57 = vpop.xlane.xlu2 %1114 }
 0x8c3   :  { %v1119_v59 = vsub.f32 %v1111_v19, %v1115_v57 }
 0x8c5   :  { %v1121_v60 = vmul.f32 1.442695, %v1119_v59  ;;  %v1118_v61 = vpop.xlane.xlu1 %1117 }
 0x8c6   :  { %v1120_v62 = vsub.f32 %v1112_v26, %v1118_v61 }
 0x8c7   :  { %1881 = vpow2.f32 %v1121_v60 }
 0x8c8   :  { %v1123_v63 = vmul.f32 1.442695, %v1120_v62 }
 0x8ca   :  { %1883 = vpow2.f32 %v1123_v63 }
 0x8cb   :  { %v999_v32 = vpop.xlane.xlu2 %998 }
 0x8cd   :  { %v2532_v3 = vpop.eup %1881  ;;  %v1002_v4 = vpop.xlane.xlu0 %1001 }
 0x8ce   :  { %1885 = vrcp.f32 %v1002_v4  ;;  %v1125_v58 = vsel %vm284_vm6, %v2532_v3, 0.0 }
 0x8cf   :  { %1126 = vadd.xlane.f32.xlu2 %v1125_v58 }
 0x8d0   :  { %v2536_v8 = vpop.eup %1883 }
 0x8d1   :  { %v1128_v5 = vsel %vm284_vm6, %v2536_v8, 0.0 }
 0x8d2   :  { %v1231_v7 = vpop.xlane.xlu1 %1230 }
 0x8d3   :  { %v1235_v9 = vsub.f32 %v1227_v39, %v1231_v7  ;;  %v1138_v17 = vpop.permute.xlu2 %1137 }
 0x8d4   :  { %v1886_v11 = vpop.eup %1885  ;;  %v1143_v2 = vsel %vm361_vm9, %v1138_v17, 0 }
 0x8d5   :  { %v1006_v6 = vmul.f32 %v1886_v11, %v1880_v35  ;;  %v1237_v12 = vmul.f32 1.442695, %v1235_v9  ;;  %v1234_v1 = vpop.xlane.xlu0 %1233 }
 0x8d6   :  { %v1236_v13 = vsub.f32 %v1228_v42, %v1234_v1 }
 0x8d7   :  { %v1008_v14 = vpack.c.bf16 %v1006_v6, %v1006_v6  ;;  %1887 = vpow2.f32 %v1237_v12  ;;  %1129 = vadd.xlane.f32.xlu2 %v1128_v5 }
 0x8d8   :  { %v1239_v15 = vmul.f32 1.442695, %v1236_v13 }
 0x8d9   :  { %1705 = vmatmul.msk.bf16.vlgmr.msrb.gmra.mxu2 %vm284_vm6, %v1008_v14 }
 0x8da   :  { %1889 = vpow2.f32 %v1239_v15 }
 0x8db   :  { %v1275_v24 = vpop.permute.xlu2 %1274 }
 0x8dc   :  { %v1280_v30 = vsel %vm361_vm9, %v1275_v24, 0 }
 0x8dd   :  { %v1888_v16 = vpop.eup %1887 }
 0x8de   :  { %v1241_v18 = vsel %vm284_vm6, %v1888_v16, 0.0 }
 0x8df   :  { %1242 = vadd.xlane.f32.xlu1 %v1241_v18 }
 0x8e0   :  { %v1890_v19 = vpop.eup %1889 }
 0x8e1   :  { %v1244_v20 = vsel %vm284_vm6, %v1890_v19, 0.0 }
 0x8e2   :  { %1245 = vadd.xlane.f32.xlu0 %v1244_v20 }
 0x8e3   :  { %v1347_v21 = vpop.xlane.xlu1 %1346 }
 0x8e4   :  { %v1351_v22 = vsub.f32 %v1343_v50, %v1347_v21 }
 0x8e6   :  { %v1353_v23 = vmul.f32 1.442695, %v1351_v22 }
 0x8e8   :  { %1891 = vpow2.f32 %v1353_v23  ;;  %v1159_v26 = vpop.permute.xlu0 %1158 }
 0x8e9   :  { %v1164_v27 = vsel %vm361_vm9, %v1159_v26, 0  ;;  %1893 = vrcp.f32 %v999_v32 }
 0x8ea   :  { %1173 = vmatpush.bf16.msra.mxu2 %v1164_v27 }
 0x8ee   :  { %1289 = vmatpush.bf16.msrb.mxu2 %v1280_v30  ;;  %v1892_v46 = vpop.eup %1891 }
 0x8ef   :  { %1253 = vrot.lane.b32.xlu2 %v2454_v29, %s2134_s3  ;;  %v1357_v31 = vsel %vm284_vm6, %v1892_v46, 0.0  ;;  %v1894_v0 = vpop.eup %1893 }
 0x8f0   :  { %1358 = vadd.xlane.f32.xlu0 %v1357_v31  ;;  %v1005_v35 = vmul.f32 %v1894_v0, %v2508_v33  ;;  %v1762_v31 = vld [vmem:[#allocation11 + $0x8] sm:$0xff]  ;;  %v1761_v0 = vld [vmem:[#allocation11] sm:$0xff] }
 0x8f1   :  { %1463 = vmatpush.bf16.msrb.mxu3 %v1762_v31 }
 0x8f2   :  { %v1007_v38 = vpack.c.bf16 %v1005_v35, %v1005_v35 }
 0x8f5   :  { %1464 = vmatpush.bf16.msrb.mxu3 %v1761_v0 }
 0x8f8   :  { %1390 = vrot.lane.b32.xlu1 %v2459_v34, %s2135_s20 }
 0x8fb   :  { %v1013_v36 = vpop.permute.xlu1 %1012 }
 0x8fc   :  { %v1018_v37 = vsel %vm361_vm9, %v1013_v36, 0 }
 0x8fd   :  { %1027 = vmatpush.bf16.msrb.mxu1 %v1018_v37 }
 0x900   :  { %1704 = vmatmul.msk.bf16.vlgmr.msrb.gmra.mxu1 %vm284_vm6, %v1007_v38 }
 0x901   :  { %1152 = vmatpush.bf16.msra.mxu1 %v1143_v2 }
 0x904   :  { %1369 = vrot.lane.b32.xlu0 %v2454_v29, %s2135_s20 }
 0x914   :  { %v1350_v39 = vpop.xlane.xlu2 %1349 }
 0x915   :  { %v1352_v40 = vsub.f32 %v2528_v55, %v1350_v39 }
 0x917   :  { %v1355_v41 = vmul.f32 1.442695, %v1352_v40 }
 0x919   :  { %1895 = vpow2.f32 %v1355_v41 }
 0x91f   :  { %v1896_v34 = vpop.eup %1895 }
 0x920   :  { %v1360_v33 = vsel %vm284_vm6, %v1896_v34, 0.0 }
 0x921   :  { %1361 = vadd.xlane.f32.xlu2 %v1360_v33 }
 0x942   :  { %v1127_v42 = vpop.xlane.xlu2 %1126 }
 0x943   :  { %1897 = vrcp.f32 %v1127_v42 }
 0x949   :  { %v1898_v43 = vpop.eup %1897 }
 0x94a   :  { %v1133_v44 = vmul.f32 %v1898_v43, %v2532_v3  ;;  %v1130_v45 = vpop.xlane.xlu2 %1129 }
 0x94b   :  { %1899 = vrcp.f32 %v1130_v45 }
 0x94c   :  { %v1135_v47 = vpack.c.bf16 %v1133_v44, %v1133_v44 }
 0x94e   :  { %1708 = vmatmul.msk.bf16.vlgmr.msra.gmra.mxu1 %vm284_vm6, %v1135_v47 }
 0x951   :  { %v1900_v29 = vpop.eup %1899 }
 0x952   :  { %v1134_v48 = vmul.f32 %v1900_v29, %v2536_v8  ;;  %v1254_v49 = vpop.permute.xlu2 %1253  ;;  %v1243_v50 = vpop.xlane.xlu1 %1242 }
 0x953   :  { %v1259_v51 = vsel %vm361_vm9, %v1254_v49, 0  ;;  %1901 = vrcp.f32 %v1243_v50 }
 0x954   :  { %v1136_v52 = vpack.c.bf16 %v1134_v48, %v1134_v48  ;;  %1268 = vmatpush.bf16.msrb.mxu1 %v1259_v51 }
 0x955   :  { %v1246_v53 = vpop.xlane.xlu0 %1245 }
 0x956   :  { %1709 = vmatmul.msk.bf16.vlgmr.msra.gmra.mxu2 %vm284_vm6, %v1136_v52  ;;  %1903 = vrcp.f32 %v1246_v53 }
 0x959   :  { %v1902_v54 = vpop.eup %1901 }
 0x95a   :  { %v1249_v55 = vmul.f32 %v1902_v54, %v1888_v16 }
 0x95c   :  { %v1251_v56 = vpack.c.bf16 %v1249_v55, %v1249_v55  ;;  %v1053_v57 = vpop.f32.mrf.mxu2  ;;  %v1904_v59 = vpop.eup %1903 }
 0x95d   :  { %v1250_v60 = vmul.f32 %v1904_v59, %v1890_v19 }
 0x95e   :  { %1712 = vmatmul.msk.bf16.vlgmr.msrb.gmra.mxu1 %vm284_vm6, %v1251_v56 }
 0x95f   :  { %v1252_v61 = vpack.c.bf16 %v1250_v60, %v1250_v60 }
 0x963   :  { %v1359_v63 = vpop.xlane.xlu0 %1358 }
 0x964   :  { %v1055_v62 = vpop.f32.mrf.mxu2  ;;  %1905 = vrcp.f32 %v1359_v63  ;;  %v1764_v63 = vld [vmem:[#allocation13 + $0x8] sm:$0xff] }
 0x965   :  { %1559 = vmatpush.bf16.msrb.mxu0 %v1764_v63 }
 0x966   :  { %1713 = vmatmul.msk.bf16.vlgmr.msrb.gmra.mxu2 %vm284_vm6, %v1252_v61 }
 0x96a   :  { %v1391_v3 = vpop.permute.xlu1 %1390  ;;  %v1906_v58 = vpop.eup %1905 }
 0x96b   :  { %v1396_v4 = vsel %vm361_vm9, %v1391_v3, 0  ;;  %v1365_v7 = vmul.f32 %v1906_v58, %v1892_v46 }
 0x96c   :  { %1405 = vmatpush.bf16.msra.mxu2 %v1396_v4  ;;  %v1763_v4 = vld [vmem:[#allocation13] sm:$0xff] }
 0x96d   :  { %v1367_v9 = vpack.c.bf16 %v1365_v7, %v1365_v7  ;;  %1560 = vmatpush.bf16.msrb.mxu0 %v1763_v4 }
 0x976   :  { %v1370_v8 = vpop.permute.xlu0 %1369 }
 0x977   :  { %v1375_v32 = vsel %vm361_vm9, %v1370_v8, 0 }
 0x978   :  { %1384 = vmatpush.bf16.msra.mxu1 %v1375_v32 }
 0x97b   :  { %1716 = vmatmul.msk.bf16.vlgmr.msra.gmra.mxu1 %vm284_vm6, %v1367_v9 }
 0x97d   :  { %v1029_v11 = vpop.f32.mrf.mxu1 }
 0x985   :  { %v1031_v6 = vpop.f32.mrf.mxu1 }
 0x986   :  { %v1768_v6 = vld [vmem:[%s2638_s11 + $0x18] sm:$0xff] }
 0x987   :  { %1614 = vmatpush.bf16.msrb.mxu1 %v1768_v6 }
 0x994   :  { %v1362_v12 = vpop.xlane.xlu2 %1361 }
 0x995   :  { %1907 = vrcp.f32 %v1362_v12 }
 0x99b   :  { %v1908_v1 = vpop.eup %1907 }
 0x99c   :  { %v1366_v13 = vmul.f32 %v1908_v1, %v1896_v34 }
 0x99e   :  { %v1368_v5 = vpack.c.bf16 %v1366_v13, %v1366_v13 }
 0x9a0   :  { %1717 = vmatmul.msk.bf16.vlgmr.msra.gmra.mxu2 %vm284_vm6, %v1368_v5 }
 0x9cb   :  { %v1154_v14 = vpop.f32.mrf.mxu1 }
 0x9d3   :  { %v1156_v15 = vpop.f32.mrf.mxu1 }
 0x9d9   :  { %v1175_v16 = vpop.f32.mrf.mxu2 }
 0x9da   :  { %v1810_v17 = vpack.i.bf16 %v1175_v16, %v1154_v14 }
 0x9db   :  { %v1270_v18 = vpop.f32.mrf.mxu1 }
 0x9dc   :  { %1811 = vrot.lane.b32.xlu1 %v1810_v17, %s2127_s17 }
 0x9e1   :  { %v1177_v19 = vpop.f32.mrf.mxu2 }
 0x9e3   :  { %v1272_v20 = vpop.f32.mrf.mxu1 }
 0x9e9   :  { %v1291_v21 = vpop.f32.mrf.mxu2 }
 0x9ea   :  { %v1815_v22 = vpack.i.bf16 %v1291_v21, %v1270_v18 }
 0x9ec   :  { %1816 = vrot.lane.b32.xlu0 %v1815_v22, %s2143_s29 }
 0x9f1   :  { %v1293_v23 = vpop.f32.mrf.mxu2 }
 0x9f8   :  { %v1386_v24 = vpop.f32.mrf.mxu1 }
 0xa00   :  { %v1388_v26 = vpop.f32.mrf.mxu1 }
 0xa23   :  { %v1407_v27 = vpop.f32.mrf.mxu2 }
 0xa24   :  { %v1820_v30 = vpack.i.bf16 %v1407_v27, %v1386_v24 }
 0xa26   :  { %1821 = vrot.lane.b32.xlu2 %v1820_v30, %s2144_s5 }
 0xa2b   :  { %v1409_v46 = vpop.f32.mrf.mxu2 }
 0xa2c   :  { %v1917_v46 = vld [vmem:[%s2640_s13] sm:$0x3f] }
 0xa2d   :  { %v1521_v31 = vperm.slane %v1917_v46, 4 }
 0xa4e   :  { %v1812_v35 = vpop.permute.xlu1 %1811 }
 0xa4f   :  { %v1814_v37 = vunpack.i.h.bf16 %v1812_v35  ;;  %v1813_v2 = vunpack.i.l.bf16 %v1812_v35 }
 0xa51   :  { %v1436_v41 = vsel %vm284_vm6, %v1053_v57, %v1814_v37  ;;  %v1435_v34 = vsel %vm284_vm6, %v1029_v11, %v1813_v2  ;;  %v1526_v2 = vperm.slane %v1917_v46, 5 }
 0xa5e   :  { %v1817_v36 = vpop.permute.xlu0 %1816 }
 0xa5f   :  { %v1819_v38 = vunpack.i.h.bf16 %v1817_v36  ;;  %v1818_v39 = vunpack.i.l.bf16 %v1817_v36 }
 0xa61   :  { %v1437_v43 = vsel %vm773_vm10, %v1435_v34, %v1818_v39  ;;  %v1438_v44 = vsel %vm773_vm10, %v1436_v41, %v1819_v38 }
 0xa80   :  { %v1822_v40 = vpop.permute.xlu2 %1821 }
 0xa81   :  { %v1824_v33 = vunpack.i.h.bf16 %v1822_v40  ;;  %v1823_v42 = vunpack.i.l.bf16 %v1822_v40 }
 0xa83   :  { %v1439_v45 = vsel %vm776_vm11, %v1437_v43, %v1823_v42  ;;  %v1440_v47 = vsel %vm776_vm11, %v1438_v44, %v1824_v33  ;;  %v1767_v33 = vld [vmem:[%s2638_s11 + $0x10] sm:$0xff]  ;;  %v1766_v42 = vld [vmem:[%s2638_s11 + $0x8] sm:$0xff]  ;;  %v1765_v43 = vld [vmem:[%s2638_s11] sm:$0xff] }
 0xa84   :  { %v1441_v29 = vpack.c.bf16 %v1440_v47, %v1439_v45  ;;  %1615 = vmatpush.bf16.msrb.mxu1 %v1767_v33  ;;  %v1825_v45 = vld [vmem:[%s2637_s10] ss:$0 sm:$0xff]  ;;  %s2145_s10 = smov [#allocation14]  }
 0xa85   :  { %s1632_s11 = sshll.u32 %s2145_s10, 4  ;;  %s1633_s11 = int_to_ptr.vmem [resolvable:$true] %s1632_s11 }
 0xa86   :  { %1726 = vmatmul.msk.bf16.vlgmr.msrb.gmra.mxu3 %vm175_vm0, %v1441_v29 }
 0xa88   :  { %1616 = vmatpush.bf16.msrb.mxu1 %v1766_v42 }
 0xa8c   :  { %1617 = vmatpush.bf16.msrb.mxu1 %v1765_v43 }
 0xb09   :  { %v1466_v48 = vpop.f32.mrf.mxu3 }
 0xb0a   :  { %v2580_v49 = vadd.f32 %v1466_v48, %v2428_v25 }
 0xb0c   :  { %v1473_v50 = vsel %vm175_vm0, %v2580_v49, 0.0 }
 0xb0d   :  { %1474 = vadd.xlane.f32.xlu1 %v1473_v50 }
 0xb11   :  { %v1468_v51 = vpop.f32.mrf.mxu3 }
 0xb12   :  { %v2585_v52 = vadd.f32 %v1468_v51, %v2433_v28 }
 0xb14   :  { %v1476_v53 = vsel %vm175_vm0, %v2585_v52, 0.0 }
 0xb15   :  { %1477 = vadd.xlane.f32.xlu0 %v1476_v53 }
 0xb80   :  { %v1475_v54 = vpop.xlane.xlu1 %1474 }
 0xb81   :  { %v1479_v55 = vmul.f32 %v1475_v54, %v2277_v10  ;;  %v1826_v54 = vld [vmem:[%s2639_s12] ss:$0 sm:$0xff] }
 0xb83   :  { %v1481_v56 = vsub.f32 %v2580_v49, %v1479_v55 }
 0xb85   :  { %v1483_v57 = vmul.f32 %v1481_v56, %v1481_v56  ;;  %v1522_v35 = vmul.f32 %v1521_v31, %v1481_v56 }
 0xb87   :  { %v1485_v25 = vsel %vm175_vm0, %v1483_v57, 0.0 }
 0xb88   :  { %1486 = vadd.xlane.f32.xlu2 %v1485_v25  ;;  %v1478_v59 = vpop.xlane.xlu0 %1477 }
 0xb89   :  { %v1480_v60 = vmul.f32 %v1478_v59, %v2277_v10 }
 0xb8b   :  { %v1482_v61 = vsub.f32 %v2585_v52, %v1480_v60 }
 0xb8d   :  { %v1484_v28 = vmul.f32 %v1482_v61, %v1482_v61  ;;  %v1523_v36 = vmul.f32 %v1521_v31, %v1482_v61 }
 0xb8f   :  { %v1488_v62 = vsel %vm175_vm0, %v1484_v28, 0.0 }
 0xb90   :  { %1489 = vadd.xlane.f32.xlu1 %v1488_v62 }
 0xbfb   :  { %v1487_v3 = vpop.xlane.xlu2 %1486 }
 0xbfc   :  { %v1491_v58 = vmul.f32 0.032258064, %v1487_v3 }
 0xbfe   :  { %1909 = vrsqrt.f32 %v1491_v58  ;;  %vm1500_vm3 = vcmp.eq.f32.partialorder %v1491_v58, inf  ;;  %v1503_v16 = vand.u32 2147483648, %v1491_v58  ;;  %vm1502_vm4 = vcmp.eq.f32.partialorder %v1491_v58, 0.0 }
 0xc03   :  { %v1490_v7 = vpop.xlane.xlu1 %1489 }
 0xc04   :  { %v1910_v8 = vpop.eup %1909  ;;  %v1492_v32 = vmul.f32 0.032258064, %v1490_v7 }
 0xc05   :  { %v1494_v9 = vmul.f32 %v1910_v8, %v1491_v58 }
 0xc06   :  { %1911 = vrsqrt.f32 %v1492_v32  ;;  %vm1512_vm5 = vcmp.eq.f32.partialorder %v1492_v32, inf  ;;  %v1515_v24 = vand.u32 2147483648, %v1492_v32  ;;  %vm1514_vm6 = vcmp.eq.f32.partialorder %v1492_v32, 0.0 }
 0xc07   :  { %v1495_v11 = vmul.f32 %v1910_v8, %v1494_v9 }
 0xc09   :  { %v1496_v10 = vmul.f32 0.5, %v1495_v11 }
 0xc0b   :  { %v1497_v12 = vsub.f32 1.5, %v1496_v10 }
 0xc0c   :  { %v1912_v1 = vpop.eup %1911 }
 0xc0d   :  { %v1498_v13 = vmul.f32 %v1910_v8, %v1497_v12  ;;  %v1506_v5 = vmul.f32 %v1912_v1, %v1492_v32 }
 0xc0f   :  { %v1499_v14 = vmul.f32 %v1498_v13, %v1491_v58  ;;  %v1507_v15 = vmul.f32 %v1912_v1, %v1506_v5 }
 0xc11   :  { %v1501_v17 = vsel %vm1500_vm3, %v1491_v58, %v1499_v14  ;;  %v1508_v18 = vmul.f32 0.5, %v1507_v15 }
 0xc12   :  { %v1504_v19 = vsel %vm1502_vm4, %v1503_v16, %v1501_v17 }
 0xc13   :  { %v1509_v20 = vsub.f32 1.5, %v1508_v18  ;;  %v1517_v22 = vadd.f32 1e-06, %v1504_v19 }
 0xc15   :  { %v1510_v21 = vmul.f32 %v1912_v1, %v1509_v20  ;;  %1913 = vrcp.f32 %v1517_v22 }
 0xc17   :  { %v1511_v23 = vmul.f32 %v1510_v21, %v1492_v32 }
 0xc19   :  { %v1513_v26 = vsel %vm1512_vm5, %v1492_v32, %v1511_v23 }
 0xc1a   :  { %v1516_v27 = vsel %vm1514_vm6, %v1515_v24, %v1513_v26 }
 0xc1b   :  { %v1518_v30 = vadd.f32 1e-06, %v1516_v27  ;;  %v1914_v0 = vpop.eup %1913 }
 0xc1c   :  { %v1524_v37 = vmul.f32 %v1914_v0, %v1522_v35 }
 0xc1d   :  { %1915 = vrcp.f32 %v1518_v30 }
 0xc1e   :  { %v1527_v40 = vadd.f32 %v1526_v2, %v1524_v37 }
 0xc23   :  { %v1916_v38 = vpop.eup %1915 }
 0xc24   :  { %v1525_v39 = vmul.f32 %v1916_v38, %v1523_v36 }
 0xc26   :  { %v1528_v41 = vadd.f32 %v1526_v2, %v1525_v39 }
 0xc28   :  { %v1529_v34 = vpack.c.bf16 %v1528_v41, %v1527_v40 }
 0xc2a   :  { %1735 = vmatmul.msk.bf16.vlgmr.msrb.gmra.mxu0 %vm175_vm0, %v1529_v34 }
 0xca7   :  { %v1562_v44 = vpop.f32.mrf.mxu0 }
 0xca8   :  { %v1563_v47 = vadd.f32 %v1825_v45, %v1562_v44 }
 0xcaa   :  { %v1567_v50 = vmax.f32 %v1563_v47, 0.0 }
 0xcaf   :  { %v1564_v29 = vpop.f32.mrf.mxu0 }
 0xcb0   :  { %v1565_v48 = vadd.f32 %v1825_v45, %v1564_v29 }
 0xcb2   :  { %v1568_v51 = vmax.f32 %v1565_v48, 0.0 }
 0xcb4   :  { %v1569_v53 = vpack.c.bf16 %v1568_v51, %v1567_v50 }
 0xcb6   :  { %1752 = vmatmul.msk.bf16.vlgmr.msrb.gmra.mxu1 %vm1606_vm7, %v1569_v53 }
 0xd33   :  { %v1619_v55 = vpop.f32.mrf.mxu1 }
 0xd34   :  { %v1620_v56 = vadd.f32 %v1826_v54, %v1619_v55 }
 0xd36   :  { %v1624_v57 = vadd.f32 %v1620_v56, %v2580_v49 }
 0xd38   :  { %1626 = vst.msk [vmem:[#allocation14] sm:$0xff] %vm175_vm0, %v1624_v57 }
 0xd3b   :  { %v1621_v25 = vpop.f32.mrf.mxu1 }
 0xd3c   :  { %v1622_v59 = vadd.f32 %v1826_v54, %v1621_v25 }
 0xd3e   :  { %v1625_v60 = vadd.f32 %v1622_v59, %v2585_v52 }
 0xd40   :  { %1627 = vst.msk [vmem:[#allocation14 + $0x8] sm:$0xff] %vm175_vm0, %v1625_v60 }
 0xd41   :  { %1640 = dma.vmem_to_hbm [thread:$0]  %s1633_s11, 256, %s1635_s2, [#allocation4], %s2126_s16, %s2126_s16, %s2127_s17  }
 0xd42   :  { %2118 = dma.done.wait [#allocation4], 256  }
 0xd43   :  { %2119 = vsyncadd [#allocation4], 4294967040 }
 0xd44   :  { %1645 = vsyncpa [#allocation3], 1 }
 0xd45   :  { %1646 = vsyncpa [#allocation6], 1 }
 0xd46   :  { %1647 = vsyncpa [#allocation9], 1 }
 0xd47   :  { %1648 = vsyncpa [#allocation12], 1 }
 0xd48   :  { %1649 = vsyncpa [#allocation4], 1 }

</bundles_post_ra>
